<compile_context>
chip_gen: v5e
topology: v5e:2x2
jax: 0.10.0
libtpu: 0.0.40
codegen_flags: <defaults>
</compile_context>

<pallas_src>
import jax
import jax.numpy as jnp
from jax import lax
from jax.experimental import pallas as pl
from jax.experimental.pallas import tpu as pltpu

# ---------------- model hyper-parameters (synthetic, deterministic) ----------
N_NODES    = 200     # graph nodes (padded to a multiple of TM inside the wrapper)
INPUT_DIM  = 16
HIDDEN_DIM = 32
OUTPUT_DIM = 8
EPSILON    = 0.1
ITERATIONS = 2       # must be >= 1

TM   = 128           # node-row tile (keeps the MXU M dimension full)
LANE = 128           # lane width; all feature dims padded to a multiple of this


def _round_up(x, m):
    return ((x + m - 1) // m) * m


def _pad2(a, rows, cols):
    r, c = a.shape
    return jnp.pad(a, ((0, rows - r), (0, cols - c)))


def dgc_kernel(x_ref, w_emb_ref, b_emb_ref, a_ref, w_ro_ref, b_ro_ref,
               o_ref, xa_ref, xb_ref):
    """Grid step (t, i): phase t on node-row tile i.

    t == 0               : embed tile i                  -> xa
    t odd  (>= 1)        : diffusion step, xa -> xb      (this row tile only)
    t even (>= 2)        : diffusion step, xb -> xa
    t == ITERATIONS      : additionally tanh + readout   -> o_ref
    """
    t = pl.program_id(0)
    i = pl.program_id(1)
    n_t = pl.num_programs(0)
    tm = o_ref.shape[0]
    r0 = pl.multiple_of(i * tm, tm)

    @pl.when(t == 0)
    def _embed():
        emb = jnp.dot(x_ref[...], w_emb_ref[...],
                      preferred_element_type=jnp.float32) + b_emb_ref[...]
        xa_ref[pl.ds(r0, tm), :] = emb

    def _diffuse(src_ref, dst_ref):
        x_full = src_ref[...]                       # (N_pad, H_pad) resident state
        x_tile = src_ref[pl.ds(r0, tm), :]          # (TM, H_pad)
        # x <- x - eps * (A_norm @ x), this row tile only
        dst_ref[pl.ds(r0, tm), :] = x_tile - EPSILON * jnp.dot(
            a_ref[...], x_full, preferred_element_type=jnp.float32)

    @pl.when((t > 0) & (lax.rem(t, 2) == 1))
    def _diffuse_odd():
        _diffuse(xa_ref, xb_ref)

    @pl.when((t > 0) & (lax.rem(t, 2) == 0))
    def _diffuse_even():
        _diffuse(xb_ref, xa_ref)

    @pl.when(t == n_t - 1)
    def _readout():
        # ITERATIONS is a static Python constant -> final buffer is chosen statically.
        final_ref = xb_ref if (ITERATIONS % 2 == 1) else xa_ref
        y = jnp.tanh(final_ref[pl.ds(r0, tm), :])
        o_ref[...] = jnp.dot(y, w_ro_ref[...],
                             preferred_element_type=jnp.float32) + b_ro_ref[...]


def dgc_forward(x, w_emb, b_emb, a_norm, w_ro, b_ro):
    assert ITERATIONS >= 1
    n, d_in = x.shape
    h = w_emb.shape[1]
    o = w_ro.shape[1]

    n_pad = _round_up(n, TM)
    d_pad = _round_up(d_in, LANE)
    h_pad = _round_up(h, LANE)
    o_pad = _round_up(o, LANE)

    f32 = jnp.float32
    xp  = _pad2(x.astype(f32), n_pad, d_pad)
    wep = _pad2(w_emb.astype(f32), d_pad, h_pad)
    bep = _pad2(b_emb.astype(f32), 1, h_pad)
    ap  = _pad2(a_norm.astype(f32), n_pad, n_pad)
    wrp = _pad2(w_ro.astype(f32), h_pad, o_pad)
    brp = _pad2(b_ro.astype(f32), 1, o_pad)

    n_tiles = n_pad // TM
    grid = (ITERATIONS + 1, n_tiles)

    # Explicit VMEM budget: double-buffered BlockSpec tiles + resident x scratch.
    itemsize = 4
    tile_bytes = 2 * itemsize * (TM * d_pad + d_pad * h_pad + h_pad
                                 + TM * n_pad + h_pad * o_pad + o_pad
                                 + TM * o_pad)
    scratch_bytes = 2 * n_pad * h_pad * itemsize
    vmem_limit = int(min(max(2 * (tile_bytes + scratch_bytes), 8 << 20), 32 << 20))

    cost = pl.CostEstimate(
        flops=(2 * n_pad * d_pad * h_pad
               + ITERATIONS * 2 * n_pad * n_pad * h_pad
               + 2 * n_pad * h_pad * o_pad),
        transcendentals=n_pad * h_pad,
        bytes_accessed=itemsize * (n_pad * d_pad + d_pad * h_pad + h_pad
                                   + ITERATIONS * n_pad * n_pad
                                   + h_pad * o_pad + o_pad + n_pad * o_pad),
    )

    grid_spec = pltpu.PrefetchScalarGridSpec(
        num_scalar_prefetch=0,
        grid=grid,
        in_specs=[
            # raw features: only needed at phase 0; collapse to block 0 afterwards so
            # the pipeline skips redundant DMAs on later phases.
            pl.BlockSpec((TM, d_pad),    lambda t, i: (jnp.where(t == 0, i, 0), 0)),
            pl.BlockSpec((d_pad, h_pad), lambda t, i: (0, 0)),   # W_emb (VMEM-resident)
            pl.BlockSpec((1, h_pad),     lambda t, i: (0, 0)),   # b_emb
            # A_norm row block: only needed on diffusion phases (t > 0).
            pl.BlockSpec((TM, n_pad),    lambda t, i: (jnp.where(t > 0, i, 0), 0)),
            pl.BlockSpec((h_pad, o_pad), lambda t, i: (0, 0)),   # W_readout
            pl.BlockSpec((1, o_pad),     lambda t, i: (0, 0)),   # b_readout
        ],
        out_specs=pl.BlockSpec((TM, o_pad), lambda t, i: (i, 0)),
        scratch_shapes=[pltpu.VMEM((n_pad, h_pad), jnp.float32),   # ping
                        pltpu.VMEM((n_pad, h_pad), jnp.float32)],  # pong
    )

    out_pad = pl.pallas_call(
        dgc_kernel,
        out_shape=jax.ShapeDtypeStruct((n_pad, o_pad), jnp.float32),
        grid_spec=grid_spec,
        compiler_params=pltpu.CompilerParams(
            # Both axes sequential: diffusion phase t reads the full x produced by
            # phase t-1 across all row tiles, held in per-core VMEM scratch.
            dimension_semantics=("arbitrary", "arbitrary"),
            vmem_limit_bytes=vmem_limit,
        ),
        cost_estimate=cost,
    )(xp, wep, bep, ap, wrp, brp)

    return out_pad[:n, :o]


def gcn_norm_dense(edge_index, num_nodes):
    """Dense equivalent of torch_geometric gcn_norm (improved=True, add_self_loops=True).
    Returns A_norm with A_norm[dst, src]."""
    src, dst = edge_index[0], edge_index[1]
    a = jnp.zeros((num_nodes, num_nodes), jnp.float32).at[dst, src].add(1.0)
    a_hat = a + 2.0 * jnp.eye(num_nodes, dtype=jnp.float32)   # improved: fill=2
    deg = a_hat.sum(axis=1)
    d_inv_sqrt = jnp.where(deg > 0, 1.0 / jnp.sqrt(deg), 0.0)
    return d_inv_sqrt[:, None] * a_hat * d_inv_sqrt[None, :]


def linear_init(key, fan_in, fan_out):
    """PyTorch nn.Linear default init: U(-1/sqrt(fan_in), 1/sqrt(fan_in))."""
    kw, kb = jax.random.split(key)
    bound = 1.0 / jnp.sqrt(fan_in)
    w = jax.random.uniform(kw, (fan_in, fan_out), jnp.float32, -bound, bound)
    b = jax.random.uniform(kb, (1, fan_out), jnp.float32, -bound, bound)
    return w, b


def reference_forward(x, w_emb, b_emb, a_norm, w_ro, b_ro):
    h = jnp.dot(x, w_emb, preferred_element_type=jnp.float32) + b_emb
    for _ in range(ITERATIONS):
        h = h - EPSILON * jnp.dot(a_norm, h, preferred_element_type=jnp.float32)
    h = jnp.tanh(h)
    return jnp.dot(h, w_ro, preferred_element_type=jnp.float32) + b_ro


if __name__ == "__main__":
    key = jax.random.PRNGKey(0)
    k_x, k_emb, k_ro = jax.random.split(key, 3)

    # node features [N, INPUT_DIM]
    x = jax.random.normal(k_x, (N_NODES, INPUT_DIM), jnp.float32)

    # deterministic ring graph (bidirectional edges), no pre-existing self loops
    fwd = jnp.arange(N_NODES, dtype=jnp.int32)
    nxt = (fwd + 1) % N_NODES
    edge_index = jnp.stack([jnp.concatenate([fwd, nxt]),
                            jnp.concatenate([nxt, fwd])], axis=0)  # [2, 2N]

    a_norm = gcn_norm_dense(edge_index, N_NODES)

    # deterministic parameters (synthetic, not loaded from a checkpoint)
    w_emb, b_emb = linear_init(k_emb, INPUT_DIM, HIDDEN_DIM)
    w_ro, b_ro = linear_init(k_ro, HIDDEN_DIM, OUTPUT_DIM)

    dgc_jit = jax.jit(dgc_forward)   # fuse padding + pallas_call + slice into one jit
    out = jax.block_until_ready(dgc_jit(x, w_emb, b_emb, a_norm, w_ro, b_ro))

    ref = reference_forward(x, w_emb, b_emb, a_norm, w_ro, b_ro)
    assert out.shape == (N_NODES, OUTPUT_DIM)
    err = float(jnp.max(jnp.abs(out - ref)))
    assert jnp.allclose(out, ref, atol=1e-3, rtol=1e-3), err

    print("KERNEL_OK")
</pallas_src>

<mosaic_0001>
module attributes {stable_mosaic.version = 11 : i64} {
  func.func @dgc_kernel(%arg0: i32, %arg1: i32, %arg2: memref<128x128xf32, #tpu.memory_space<vmem>>, %arg3: memref<128x128xf32, #tpu.memory_space<vmem>>, %arg4: memref<1x128xf32, #tpu.memory_space<vmem>>, %arg5: memref<128x256xf32, #tpu.memory_space<vmem>>, %arg6: memref<128x128xf32, #tpu.memory_space<vmem>>, %arg7: memref<1x128xf32, #tpu.memory_space<vmem>>, %arg8: memref<128x128xf32, #tpu.memory_space<vmem>>, %arg9: memref<256x128xf32, #tpu.memory_space<vmem>>, %arg10: memref<256x128xf32, #tpu.memory_space<vmem>>) attributes {dimension_semantics = [#tpu.dimension_semantics<arbitrary>, #tpu.dimension_semantics<arbitrary>], iteration_bounds = array<i64: 3, 2>, scalar_prefetch = 0 : i64, scratch_operands = 2 : i64, tpu.core_type = #tpu.core_type<tc>, window_params = [{transform_indices = @transform_0, window_bounds = array<i64: 128, 128>}, {pipeline_mode = #tpu.pipeline_mode<synchronous>, transform_indices = @transform_1, window_bounds = array<i64: 128, 128>}, {pipeline_mode = #tpu.pipeline_mode<synchronous>, transform_indices = @transform_2, window_bounds = array<i64: 1, 128>}, {transform_indices = @transform_3, window_bounds = array<i64: 128, 256>}, {pipeline_mode = #tpu.pipeline_mode<synchronous>, transform_indices = @transform_4, window_bounds = array<i64: 128, 128>}, {pipeline_mode = #tpu.pipeline_mode<synchronous>, transform_indices = @transform_5, window_bounds = array<i64: 1, 128>}, {transform_indices = @transform_6, window_bounds = array<i64: 128, 128>}]} {
    %c128_i32 = arith.constant 128 : i32
    %0 = arith.muli %arg1, %c128_i32 : i32
    %1 = tpu.assume_multiple %0, 128 : i32
    %c0_i32 = arith.constant 0 : i32
    %2 = arith.cmpi eq, %arg0, %c0_i32 : i32
    %3 = arith.extui %2 : i1 to i32
    %c0_i32_0 = arith.constant 0 : i32
    %4 = arith.cmpi ne, %3, %c0_i32_0 : i32
    scf.if %4 {
      %c0 = arith.constant 0 : index
      %c0_9 = arith.constant 0 : index
      %20 = vector.load %arg2[%c0, %c0_9] : memref<128x128xf32, #tpu.memory_space<vmem>>, vector<128x128xf32>
      %c0_10 = arith.constant 0 : index
      %c0_11 = arith.constant 0 : index
      %21 = vector.load %arg3[%c0_10, %c0_11] : memref<128x128xf32, #tpu.memory_space<vmem>>, vector<128x128xf32>
      %cst = arith.constant dense<0.000000e+00> : vector<128x128xf32>
      %22 = tpu.matmul %20, %21, %cst {dimension_numbers = #tpu.dot_dimension_numbers<[1], [0], [0], [1], [0, 0, 1, 1], [], []>} : vector<128x128xf32>, vector<128x128xf32>, vector<128x128xf32> -> vector<128x128xf32>
      %c0_12 = arith.constant 0 : index
      %c0_13 = arith.constant 0 : index
      %23 = vector.load %arg4[%c0_12, %c0_13] : memref<1x128xf32, #tpu.memory_space<vmem>>, vector<1x128xf32>
      %24 = vector.broadcast %23 : vector<1x128xf32> to vector<128x128xf32>
      %25 = arith.addf %22, %24 : vector<128x128xf32>
      %26 = arith.index_cast %1 : i32 to index
      %c0_14 = arith.constant 0 : index
      %27 = vector.load %arg9[%26, %c0_14] : memref<256x128xf32, #tpu.memory_space<vmem>>, vector<128x128xf32>
      tpu.vector_store %arg9[%26, %c0_14], %25 {strides = array<i32>} : memref<256x128xf32, #tpu.memory_space<vmem>>, vector<128x128xf32>,
    } else {
    }
    %c0_i32_1 = arith.constant 0 : i32
    %5 = arith.cmpi sgt, %arg0, %c0_i32_1 : i32
    %c2_i32 = arith.constant 2 : i32
    %6 = arith.remsi %arg0, %c2_i32 : i32
    %c1_i32 = arith.constant 1 : i32
    %7 = arith.cmpi eq, %6, %c1_i32 : i32
    %8 = arith.andi %5, %7 : i1
    %9 = arith.extui %8 : i1 to i32
    %c0_i32_2 = arith.constant 0 : i32
    %10 = arith.cmpi ne, %9, %c0_i32_2 : i32
    scf.if %10 {
      %c0 = arith.constant 0 : index
      %c0_9 = arith.constant 0 : index
      %20 = vector.load %arg9[%c0, %c0_9] : memref<256x128xf32, #tpu.memory_space<vmem>>, vector<256x128xf32>
      %21 = arith.index_cast %1 : i32 to index
      %c0_10 = arith.constant 0 : index
      %22 = vector.load %arg9[%21, %c0_10] : memref<256x128xf32, #tpu.memory_space<vmem>>, vector<128x128xf32>
      %c0_11 = arith.constant 0 : index
      %c0_12 = arith.constant 0 : index
      %23 = vector.load %arg5[%c0_11, %c0_12] : memref<128x256xf32, #tpu.memory_space<vmem>>, vector<128x256xf32>
      %cst = arith.constant dense<0.000000e+00> : vector<128x128xf32>
      %24 = tpu.matmul %23, %20, %cst {dimension_numbers = #tpu.dot_dimension_numbers<[1], [0], [0], [1], [0, 0, 1, 1], [], []>} : vector<128x256xf32>, vector<256x128xf32>, vector<128x128xf32> -> vector<128x128xf32>
      %cst_13 = arith.constant 1.000000e-01 : f32
      %25 = vector.broadcast %cst_13 : f32 to vector<128x128xf32>
      %26 = arith.mulf %25, %24 : vector<128x128xf32>
      %27 = arith.subf %22, %26 : vector<128x128xf32>
      %28 = arith.index_cast %1 : i32 to index
      %c0_14 = arith.constant 0 : index
      %29 = vector.load %arg10[%28, %c0_14] : memref<256x128xf32, #tpu.memory_space<vmem>>, vector<128x128xf32>
      tpu.vector_store %arg10[%28, %c0_14], %27 {strides = array<i32>} : memref<256x128xf32, #tpu.memory_space<vmem>>, vector<128x128xf32>,
    } else {
    }
    %c0_i32_3 = arith.constant 0 : i32
    %11 = arith.cmpi sgt, %arg0, %c0_i32_3 : i32
    %c2_i32_4 = arith.constant 2 : i32
    %12 = arith.remsi %arg0, %c2_i32_4 : i32
    %c0_i32_5 = arith.constant 0 : i32
    %13 = arith.cmpi eq, %12, %c0_i32_5 : i32
    %14 = arith.andi %11, %13 : i1
    %15 = arith.extui %14 : i1 to i32
    %c0_i32_6 = arith.constant 0 : i32
    %16 = arith.cmpi ne, %15, %c0_i32_6 : i32
    scf.if %16 {
      %c0 = arith.constant 0 : index
      %c0_9 = arith.constant 0 : index
      %20 = vector.load %arg10[%c0, %c0_9] : memref<256x128xf32, #tpu.memory_space<vmem>>, vector<256x128xf32>
      %21 = arith.index_cast %1 : i32 to index
      %c0_10 = arith.constant 0 : index
      %22 = vector.load %arg10[%21, %c0_10] : memref<256x128xf32, #tpu.memory_space<vmem>>, vector<128x128xf32>
      %c0_11 = arith.constant 0 : index
      %c0_12 = arith.constant 0 : index
      %23 = vector.load %arg5[%c0_11, %c0_12] : memref<128x256xf32, #tpu.memory_space<vmem>>, vector<128x256xf32>
      %cst = arith.constant dense<0.000000e+00> : vector<128x128xf32>
      %24 = tpu.matmul %23, %20, %cst {dimension_numbers = #tpu.dot_dimension_numbers<[1], [0], [0], [1], [0, 0, 1, 1], [], []>} : vector<128x256xf32>, vector<256x128xf32>, vector<128x128xf32> -> vector<128x128xf32>
      %cst_13 = arith.constant 1.000000e-01 : f32
      %25 = vector.broadcast %cst_13 : f32 to vector<128x128xf32>
      %26 = arith.mulf %25, %24 : vector<128x128xf32>
      %27 = arith.subf %22, %26 : vector<128x128xf32>
      %28 = arith.index_cast %1 : i32 to index
      %c0_14 = arith.constant 0 : index
      %29 = vector.load %arg9[%28, %c0_14] : memref<256x128xf32, #tpu.memory_space<vmem>>, vector<128x128xf32>
      tpu.vector_store %arg9[%28, %c0_14], %27 {strides = array<i32>} : memref<256x128xf32, #tpu.memory_space<vmem>>, vector<128x128xf32>,
    } else {
    }
    %c2_i32_7 = arith.constant 2 : i32
    %17 = arith.cmpi eq, %arg0, %c2_i32_7 : i32
    %18 = arith.extui %17 : i1 to i32
    %c0_i32_8 = arith.constant 0 : i32
    %19 = arith.cmpi ne, %18, %c0_i32_8 : i32
    scf.if %19 {
      %20 = arith.index_cast %1 : i32 to index
      %c0 = arith.constant 0 : index
      %21 = vector.load %arg9[%20, %c0] : memref<256x128xf32, #tpu.memory_space<vmem>>, vector<128x128xf32>
      %22 = math.tanh %21 : vector<128x128xf32>
      %c0_9 = arith.constant 0 : index
      %c0_10 = arith.constant 0 : index
      %23 = vector.load %arg6[%c0_9, %c0_10] : memref<128x128xf32, #tpu.memory_space<vmem>>, vector<128x128xf32>
      %cst = arith.constant dense<0.000000e+00> : vector<128x128xf32>
      %24 = tpu.matmul %22, %23, %cst {dimension_numbers = #tpu.dot_dimension_numbers<[1], [0], [0], [1], [0, 0, 1, 1], [], []>} : vector<128x128xf32>, vector<128x128xf32>, vector<128x128xf32> -> vector<128x128xf32>
      %c0_11 = arith.constant 0 : index
      %c0_12 = arith.constant 0 : index
      %25 = vector.load %arg7[%c0_11, %c0_12] : memref<1x128xf32, #tpu.memory_space<vmem>>, vector<1x128xf32>
      %26 = vector.broadcast %25 : vector<1x128xf32> to vector<128x128xf32>
      %27 = arith.addf %24, %26 : vector<128x128xf32>
      %c0_13 = arith.constant 0 : index
      %c0_14 = arith.constant 0 : index
      %28 = vector.load %arg8[%c0_13, %c0_14] : memref<128x128xf32, #tpu.memory_space<vmem>>, vector<128x128xf32>
      tpu.vector_store %arg8[%c0_13, %c0_14], %27 {strides = array<i32>} : memref<128x128xf32, #tpu.memory_space<vmem>>, vector<128x128xf32>,
    } else {
    }
    return
  }
  func.func @transform_0(%arg0: i32, %arg1: i32) -> (i32, i32) {
    %c0_i32 = arith.constant 0 : i32
    %0 = arith.cmpi eq, %arg0, %c0_i32 : i32
    %c0_i32_0 = arith.constant 0 : i32
    %1 = arith.select %0, %arg1, %c0_i32_0 : i32
    %c0_i32_1 = arith.constant 0 : i32
    %c0_i32_2 = arith.constant 0 : i32
    return %1, %c0_i32_1 : i32, i32
  }
  func.func @transform_1(%arg0: i32, %arg1: i32) -> (i32, i32) {
    %c0_i32 = arith.constant 0 : i32
    %c0_i32_0 = arith.constant 0 : i32
    %c0_i32_1 = arith.constant 0 : i32
    return %c0_i32, %c0_i32_0 : i32, i32
  }
  func.func @transform_2(%arg0: i32, %arg1: i32) -> (i32, i32) {
    %c0_i32 = arith.constant 0 : i32
    %c0_i32_0 = arith.constant 0 : i32
    %c0_i32_1 = arith.constant 0 : i32
    return %c0_i32, %c0_i32_0 : i32, i32
  }
  func.func @transform_3(%arg0: i32, %arg1: i32) -> (i32, i32) {
    %c0_i32 = arith.constant 0 : i32
    %0 = arith.cmpi sgt, %arg0, %c0_i32 : i32
    %c0_i32_0 = arith.constant 0 : i32
    %1 = arith.select %0, %arg1, %c0_i32_0 : i32
    %c0_i32_1 = arith.constant 0 : i32
    %c0_i32_2 = arith.constant 0 : i32
    return %1, %c0_i32_1 : i32, i32
  }
  func.func @transform_4(%arg0: i32, %arg1: i32) -> (i32, i32) {
    %c0_i32 = arith.constant 0 : i32
    %c0_i32_0 = arith.constant 0 : i32
    %c0_i32_1 = arith.constant 0 : i32
    return %c0_i32, %c0_i32_0 : i32, i32
  }
  func.func @transform_5(%arg0: i32, %arg1: i32) -> (i32, i32) {
    %c0_i32 = arith.constant 0 : i32
    %c0_i32_0 = arith.constant 0 : i32
    %c0_i32_1 = arith.constant 0 : i32
    return %c0_i32, %c0_i32_0 : i32, i32
  }
  func.func @transform_6(%arg0: i32, %arg1: i32) -> (i32, i32) {
    %c0_i32 = arith.constant 0 : i32
    %c0_i32_0 = arith.constant 0 : i32
    return %arg1, %c0_i32 : i32, i32
  }
}

</mosaic_0001>

<bundles_post_ra>
// kernel: dgc_forward.1
= control target key start
LH: loop header
LB: loop body
LE: loop exit
PB: predicated region body
PF: predicated region fallthrough
CT: control target
= control target key end

     0   :  { %s1538_s21 = smov 0   ;;  %s1540_s22 = smov 0   ;;  %s1937_s0 = inlined_call_operand.vmem [shape: f32[256,128], index: 0, kind: input, shape index: {}]   ;;  %s1938_s1 = inlined_call_operand.vmem [shape: f32[128,128], index: 1, kind: input, shape index: {}]   ;;  %s1939_s2 = inlined_call_operand.vmem [shape: f32[1,128], index: 2, kind: input, shape index: {}]   ;;  %s1940_s3 = inlined_call_operand.vmem [shape: f32[256,256], index: 3, kind: input, shape index: {}]   ;;  %s1941_s4 = inlined_call_operand.vmem [shape: f32[128,128], index: 4, kind: input, shape index: {}]   ;;  %s1942_s5 = inlined_call_operand.vmem [shape: f32[1,128], index: 5, kind: input, shape index: {}]   ;;  %s1943_s6 = inlined_call_operand.vmem [shape: f32[256,128], index: 6, kind: output, shape index: {}]  }
   0x1   :  { %s1542_s23 = smov 0   ;;  %s1544_s24 = smov 0  }
   0x2   :  { %s1546_s25 = smov 0  }
   0x3 LB: > { %s25_s26 = sadd.s32 1, %s1493_s23  ;;  %s28_s27 = sadd.s32 1, %s1497_s24  ;;  %s1501_s25 = sphi %s1546_s25, %s16_s25   ;;  %s1497_s24 = sphi %s1544_s24, %s1947_s24   ;;  %s1493_s23 = sphi %s1542_s23, %s1946_s23   ;;  %s1489_s22 = sphi %s1540_s22, %s1945_s22   ;;  %s1485_s21 = sphi %s1538_s21, %s1944_s21  }
   0x4   : > { %p26_p0 = scmp.ge.s32.totalorder %s25_s26, 2  ;;  %p1214_p1 = scmp.ge.s32.totalorder %s1501_s25, 1 }
   0x5   : > { %p253_p2 = scmp.lt.s32.totalorder %s1501_s25, 7 }
   0x6   : > { %s1949_s26 = smov (%p26_p0, %s25_s26), 0  ;;  %s1951_s27 = smov (!%p26_p0, %s28_s27), %s1497_s24 }
   0x7   : > { %p254_p3 = pnand %p1214_p1, %p253_p2  ;;  %p30_p4 = scmp.ge.s32.totalorder %s1951_s27, 3 }
   0x8   : > { %p293_p5 = scmp.eq.s32.totalorder (!%p254_p3), %s1489_s22, 0  ;;  %p303_p6 = scmp.gt.s32.totalorder (!%p254_p3), %s1489_s22, 0 }
   0x9   : > { %s1953_s27 = smov (%p30_p4, %s1951_s27), 0  ;;  %257 = sbr.rel (%p254_p3) target bundleno = 893 (0x37d), region = 44 }
   0xa   : > { %s1220_s28 = sshll.u32 (!%p254_p3), %s1485_s21, 4  ;;  %s1576_s29 = sshll.u32 (!%p254_p3), %s1485_s21, 7 }
   0xb   : > { %p315_p9 = scmp.lt.s32.totalorder (!%p254_p3), %s1220_s28, 31  ;;  %p1223_p10 = scmp.ne.s32.totalorder (!%p254_p3), %s1489_s22, 0 }
   0xe   : > { %s294_s30 = scalar_select %p293_p5, %s1485_s21, 0 }
   0xf   : > { %s1955_s21 = smov (!%p303_p6, %s1485_s21), 0  ;;  %s1961_s28 = smov (!%p315_p9, %s1220_s28), 31 }
  0x10   : > { %s1215_s7 = sshll.u32 %s294_s30, 4  ;;  %s1217_s8 = sshll.u32 %s1955_s21, 4 }
  0x11   : > { %p296_p7 = scmp.lt.s32.totalorder %s1215_s7, 31  ;;  %p306_p8 = scmp.lt.s32.totalorder %s1217_s8, 31 }
  0x12   : > { %s1221_s17 = sshll.u32 %s1961_s28, 3  ;;  %324 = sbr.rel (%p1223_p10) target bundleno = 215 (0xd7), region = 48 }
  0x13   : > { %s1957_s7 = smov (!%p296_p7, %s1215_s7), 31  ;;  %s1959_s8 = smov (!%p306_p8, %s1217_s8), 31 }
  0x14   : > { %s1216_s9 = sshll.u32 %s1957_s7, 3  ;;  %s1228_s13 = sshll.u32 %s1959_s8, 4 }
  0x15   : > { %s1585_s12 = scalar_lea.vmem %s1937_s0, %s1216_s9  ;;  %s1590_s16 = scalar_lea.vmem %s1940_s3, %s1228_s13 }
  0x16   : > { %s1595_s20 = scalar_lea.vmem %s1943_s6, %s1221_s17  ;;  %s1666_s10 = scalar_lea.vmem (!%p1223_p10), [#allocation2], %s1576_s29 }
  0x17   : > { %v356_v0 = vld [vmem:[%s1938_s1 + $0x78] sm:$0xff]  ;;  %v355_v1 = vld [vmem:[%s1938_s1 + $0x70] sm:$0xff]  ;;  %v354_v2 = vld [vmem:[%s1938_s1 + $0x68] sm:$0xff] }
  0x18   : > { %1230 = vmatpush.msra.mxu2 %v356_v0  ;;  %1231 = vmatpush.msra.mxu3 %v356_v0  ;;  %v353_v3 = vld [vmem:[%s1938_s1 + $0x60] sm:$0xff]  ;;  %v352_v4 = vld [vmem:[%s1938_s1 + $0x58] sm:$0xff]  ;;  %v351_v5 = vld [vmem:[%s1938_s1 + $0x50] sm:$0xff] }
  0x19   : > { %361 = vmatpush.msra.mxu0 %v356_v0  ;;  %1229 = vmatpush.msra.mxu1 %v356_v0  ;;  %v350_v6 = vld [vmem:[%s1938_s1 + $0x48] sm:$0xff]  ;;  %v349_v7 = vld [vmem:[%s1938_s1 + $0x40] sm:$0xff]  ;;  %v348_v8 = vld [vmem:[%s1938_s1 + $0x38] sm:$0xff] }
  0x1a   : > { %1233 = vmatpush.msra.mxu2 %v355_v1  ;;  %1234 = vmatpush.msra.mxu3 %v355_v1  ;;  %v347_v9 = vld [vmem:[%s1938_s1 + $0x30] sm:$0xff]  ;;  %v346_v10 = vld [vmem:[%s1938_s1 + $0x28] sm:$0xff]  ;;  %v345_v11 = vld [vmem:[%s1938_s1 + $0x20] sm:$0xff] }
  0x1b   : > { %362 = vmatpush.msra.mxu0 %v355_v1  ;;  %1232 = vmatpush.msra.mxu1 %v355_v1  ;;  %v344_v12 = vld [vmem:[%s1938_s1 + $0x18] sm:$0xff]  ;;  %v343_v13 = vld [vmem:[%s1938_s1 + $0x10] sm:$0xff]  ;;  %v342_v14 = vld [vmem:[%s1938_s1 + $0x8] sm:$0xff] }
  0x1c   : > { %1236 = vmatpush.msra.mxu2 %v354_v2  ;;  %1237 = vmatpush.msra.mxu3 %v354_v2  ;;  %v341_v15 = vld [vmem:[%s1938_s1] sm:$0xff]  ;;  %v334_v20 = vld [vmem:[%s1585_s12 + $0x48] sm:$0xff]  ;;  %v335_v24 = vld [vmem:[%s1585_s12 + $0x50] sm:$0xff] }
  0x1d   : > { %363 = vmatpush.msra.mxu0 %v354_v2  ;;  %1235 = vmatpush.msra.mxu1 %v354_v2  ;;  %v333_v16 = vld [vmem:[%s1585_s12 + $0x40] sm:$0xff]  ;;  %v338_v21 = vld [vmem:[%s1585_s12 + $0x68] sm:$0xff]  ;;  %v339_v25 = vld [vmem:[%s1585_s12 + $0x70] sm:$0xff] }
  0x1e   : > { %1239 = vmatpush.msra.mxu2 %v353_v3  ;;  %1240 = vmatpush.msra.mxu3 %v353_v3  ;;  %v337_v17 = vld [vmem:[%s1585_s12 + $0x60] sm:$0xff]  ;;  %v326_v22 = vld [vmem:[%s1585_s12 + $0x8] sm:$0xff]  ;;  %v327_v26 = vld [vmem:[%s1585_s12 + $0x10] sm:$0xff] }
  0x1f   : > { %364 = vmatpush.msra.mxu0 %v353_v3  ;;  %1238 = vmatpush.msra.mxu1 %v353_v3  ;;  %v325_v18 = vld [vmem:[%s1585_s12] sm:$0xff]  ;;  %v330_v23 = vld [vmem:[%s1585_s12 + $0x28] sm:$0xff]  ;;  %v331_v27 = vld [vmem:[%s1585_s12 + $0x30] sm:$0xff] }
  0x20   : > { %1242 = vmatpush.msra.mxu2 %v352_v4  ;;  %1243 = vmatpush.msra.mxu3 %v352_v4  ;;  %v329_v19 = vld [vmem:[%s1585_s12 + $0x20] sm:$0xff]  ;;  %v336_v28 = vld [vmem:[%s1585_s12 + $0x58] sm:$0xff] }
  0x21   : > { %365 = vmatpush.msra.mxu0 %v352_v4  ;;  %1241 = vmatpush.msra.mxu1 %v352_v4  ;;  %v340_v29 = vld [vmem:[%s1585_s12 + $0x78] sm:$0xff]  ;;  %v1429_v32 = vld [vmem:[%s1939_s2] ss:$0 sm:$0xff] }
  0x22   : > { %1245 = vmatpush.msra.mxu2 %v351_v5  ;;  %1246 = vmatpush.msra.mxu3 %v351_v5  ;;  %v328_v30 = vld [vmem:[%s1585_s12 + $0x18] sm:$0xff] }
  0x23   : > { %366 = vmatpush.msra.mxu0 %v351_v5  ;;  %1244 = vmatpush.msra.mxu1 %v351_v5  ;;  %v332_v31 = vld [vmem:[%s1585_s12 + $0x38] sm:$0xff] }
  0x24   : > { %1248 = vmatpush.msra.mxu2 %v350_v6  ;;  %1249 = vmatpush.msra.mxu3 %v350_v6 }
  0x25   : > { %367 = vmatpush.msra.mxu0 %v350_v6  ;;  %1247 = vmatpush.msra.mxu1 %v350_v6 }
  0x26   : > { %1251 = vmatpush.msra.mxu2 %v349_v7  ;;  %1252 = vmatpush.msra.mxu3 %v349_v7 }
  0x27   : > { %368 = vmatpush.msra.mxu0 %v349_v7  ;;  %1250 = vmatpush.msra.mxu1 %v349_v7 }
  0x28   : > { %1254 = vmatpush.msra.mxu2 %v348_v8  ;;  %1255 = vmatpush.msra.mxu3 %v348_v8 }
  0x29   : > { %369 = vmatpush.msra.mxu0 %v348_v8  ;;  %1253 = vmatpush.msra.mxu1 %v348_v8 }
  0x2a   : > { %1257 = vmatpush.msra.mxu2 %v347_v9  ;;  %1258 = vmatpush.msra.mxu3 %v347_v9 }
  0x2b   : > { %370 = vmatpush.msra.mxu0 %v347_v9  ;;  %1256 = vmatpush.msra.mxu1 %v347_v9 }
  0x2c   : > { %1260 = vmatpush.msra.mxu2 %v346_v10  ;;  %1261 = vmatpush.msra.mxu3 %v346_v10 }
  0x2d   : > { %371 = vmatpush.msra.mxu0 %v346_v10  ;;  %1259 = vmatpush.msra.mxu1 %v346_v10 }
  0x2e   : > { %1263 = vmatpush.msra.mxu2 %v345_v11  ;;  %1264 = vmatpush.msra.mxu3 %v345_v11 }
  0x2f   : > { %372 = vmatpush.msra.mxu0 %v345_v11  ;;  %1262 = vmatpush.msra.mxu1 %v345_v11 }
  0x30   : > { %1266 = vmatpush.msra.mxu2 %v344_v12  ;;  %1267 = vmatpush.msra.mxu3 %v344_v12 }
  0x31   : > { %373 = vmatpush.msra.mxu0 %v344_v12  ;;  %1265 = vmatpush.msra.mxu1 %v344_v12 }
  0x32   : > { %1269 = vmatpush.msra.mxu2 %v343_v13  ;;  %1270 = vmatpush.msra.mxu3 %v343_v13 }
  0x33   : > { %374 = vmatpush.msra.mxu0 %v343_v13  ;;  %1268 = vmatpush.msra.mxu1 %v343_v13 }
  0x34   : > { %1272 = vmatpush.msra.mxu2 %v342_v14  ;;  %1273 = vmatpush.msra.mxu3 %v342_v14 }
  0x35   : > { %375 = vmatpush.msra.mxu0 %v342_v14  ;;  %1271 = vmatpush.msra.mxu1 %v342_v14 }
  0x36   : > { %1275 = vmatpush.msra.mxu2 %v341_v15  ;;  %1276 = vmatpush.msra.mxu3 %v341_v15 }
  0x37   : > { %401 = vmatmul.f32.vlgmr.msra.gmra.mxu2 %v333_v16  ;;  %413 = vmatmul.f32.vlgmr.msra.gmra.mxu3 %v337_v17 }
  0x38   : > { %376 = vmatpush.msra.mxu0 %v341_v15  ;;  %1274 = vmatpush.msra.mxu1 %v341_v15 }
  0x39   : > { %377 = vmatmul.f32.vlgmr.msra.gmra.mxu0 %v325_v18  ;;  %389 = vmatmul.f32.vlgmr.msra.gmra.mxu1 %v329_v19 }
  0x3f   : > { %404 = vmatmul.f32.gmra.mxu2 %v334_v20  ;;  %416 = vmatmul.f32.gmra.mxu3 %v338_v21 }
  0x41   : > { %380 = vmatmul.f32.gmra.mxu0 %v326_v22  ;;  %392 = vmatmul.f32.gmra.mxu1 %v330_v23 }
  0x47   : > { %407 = vmatmul.f32.gmra.mxu2 %v335_v24  ;;  %419 = vmatmul.f32.gmra.mxu3 %v339_v25 }
  0x49   : > { %383 = vmatmul.f32.gmra.mxu0 %v327_v26  ;;  %395 = vmatmul.f32.gmra.mxu1 %v331_v27 }
  0x4f   : > { %410 = vmatmul.f32.gmra.mxu2 %v336_v28  ;;  %422 = vmatmul.f32.gmra.mxu3 %v340_v29 }
  0x51   : > { %386 = vmatmul.f32.gmra.mxu0 %v328_v30  ;;  %398 = vmatmul.f32.gmra.mxu1 %v332_v31 }
  0xb6   : > { %v378_v33 = vpop.f32.mrf.mxu0  ;;  %v390_v34 = vpop.f32.mrf.mxu1 }
  0xb7   : > { %v379_v35 = vadd.f32 %v1429_v32, %v378_v33  ;;  %v391_v36 = vadd.f32 %v1429_v32, %v390_v34 }
  0xb9   : > { %427 = vst [vmem:[%s1666_s10] sm:$0xff] %v379_v35 }
  0xba   : > { %431 = vst [vmem:[%s1666_s10 + $0x20] sm:$0xff] %v391_v36  ;;  %v402_v37 = vpop.f32.mrf.mxu2  ;;  %v414_v38 = vpop.f32.mrf.mxu3 }
  0xbb   : > { %v403_v39 = vadd.f32 %v1429_v32, %v402_v37  ;;  %v415_v40 = vadd.f32 %v1429_v32, %v414_v38 }
  0xbd   : > { %435 = vst [vmem:[%s1666_s10 + $0x40] sm:$0xff] %v403_v39 }
  0xbe   : > { %439 = vst [vmem:[%s1666_s10 + $0x60] sm:$0xff] %v415_v40  ;;  %v381_v41 = vpop.f32.mrf.mxu0  ;;  %v393_v42 = vpop.f32.mrf.mxu1 }
  0xbf   : > { %v382_v43 = vadd.f32 %v1429_v32, %v381_v41  ;;  %v394_v44 = vadd.f32 %v1429_v32, %v393_v42 }
  0xc1   : > { %428 = vst [vmem:[%s1666_s10 + $0x8] sm:$0xff] %v382_v43 }
  0xc2   : > { %432 = vst [vmem:[%s1666_s10 + $0x28] sm:$0xff] %v394_v44  ;;  %v405_v45 = vpop.f32.mrf.mxu2  ;;  %v417_v46 = vpop.f32.mrf.mxu3 }
  0xc3   : > { %v406_v47 = vadd.f32 %v1429_v32, %v405_v45  ;;  %v418_v48 = vadd.f32 %v1429_v32, %v417_v46 }
  0xc5   : > { %436 = vst [vmem:[%s1666_s10 + $0x48] sm:$0xff] %v406_v47 }
  0xc6   : > { %440 = vst [vmem:[%s1666_s10 + $0x68] sm:$0xff] %v418_v48  ;;  %v384_v49 = vpop.f32.mrf.mxu0  ;;  %v396_v50 = vpop.f32.mrf.mxu1 }
  0xc7   : > { %v385_v51 = vadd.f32 %v1429_v32, %v384_v49  ;;  %v397_v52 = vadd.f32 %v1429_v32, %v396_v50 }
  0xc9   : > { %429 = vst [vmem:[%s1666_s10 + $0x10] sm:$0xff] %v385_v51 }
  0xca   : > { %433 = vst [vmem:[%s1666_s10 + $0x30] sm:$0xff] %v397_v52  ;;  %v408_v53 = vpop.f32.mrf.mxu2  ;;  %v420_v54 = vpop.f32.mrf.mxu3 }
  0xcb   : > { %v409_v55 = vadd.f32 %v1429_v32, %v408_v53  ;;  %v421_v56 = vadd.f32 %v1429_v32, %v420_v54 }
  0xcd   : > { %437 = vst [vmem:[%s1666_s10 + $0x50] sm:$0xff] %v409_v55 }
  0xce   : > { %441 = vst [vmem:[%s1666_s10 + $0x70] sm:$0xff] %v421_v56  ;;  %v387_v57 = vpop.f32.mrf.mxu0  ;;  %v399_v58 = vpop.f32.mrf.mxu1 }
  0xcf   : > { %v388_v59 = vadd.f32 %v1429_v32, %v387_v57  ;;  %v400_v60 = vadd.f32 %v1429_v32, %v399_v58 }
  0xd1   : > { %430 = vst [vmem:[%s1666_s10 + $0x18] sm:$0xff] %v388_v59 }
  0xd2   : > { %434 = vst [vmem:[%s1666_s10 + $0x38] sm:$0xff] %v400_v60  ;;  %v411_v61 = vpop.f32.mrf.mxu2  ;;  %v423_v62 = vpop.f32.mrf.mxu3 }
  0xd3   : > { %v412_v63 = vadd.f32 %v1429_v32, %v411_v61  ;;  %v424_v0 = vadd.f32 %v1429_v32, %v423_v62 }
  0xd5   : > { %438 = vst [vmem:[%s1666_s10 + $0x58] sm:$0xff] %v412_v63 }
  0xd6   : > { %442 = vst [vmem:[%s1666_s10 + $0x78] sm:$0xff] %v424_v0 }
  0xd7 PF: > { %p444_p11 = scmp.lt.s32.totalorder %s1489_s22, 0  ;;  %s445_s12 = ssub.s32 0, %s1489_s22 }
  0xd8   : > { %s1224_s11 = smin.u32 %s1489_s22, %s445_s12 }
  0xd9   : > { %s447_s13 = sand.u32 1, %s1224_s11  }
  0xda   : > { %s448_s14 = ssub.s32 0, %s447_s13 }
  0xdb   : > { %s1963_s14 = smov (!%p444_p11, %s448_s14), %s447_s13 }
  0xdc   : > { %p450_p12 = scmp.eq.s32.totalorder %s1963_s14, 1 }
  0xde   : > { %p451_p13 = pnand %p450_p12, %p303_p6 }
  0xdf   : > { %s1725_s15 = scalar_lea.vmem (!%p451_p13), [#allocation2], %s1576_s29  ;;  %s1730_s17 = scalar_lea.vmem (!%p451_p13), [#allocation3], %s1576_s29 }
  0xe0   : > { %454 = sbr.rel (%p451_p13) target bundleno = 457 (0x1c9), region = 52 }
  0xe5   : > { %v470_v1 = vld [vmem:[#allocation2 + $0x78] sm:$0xff]  ;;  %v469_v3 = vld [vmem:[#allocation2 + $0x70] sm:$0xff]  ;;  %v468_v5 = vld [vmem:[#allocation2 + $0x68] sm:$0xff] }
  0xe6   : > { %v486_v2 = vld [vmem:[#allocation2 + $0xf8] sm:$0xff]  ;;  %1277 = vmatpush.msra.mxu2 %v470_v1  ;;  %v485_v4 = vld [vmem:[#allocation2 + $0xf0] sm:$0xff]  ;;  %v484_v6 = vld [vmem:[#allocation2 + $0xe8] sm:$0xff]  ;;  %536 = vmatpush.msra.mxu0 %v470_v1 }
  0xe7   : > { %1293 = vmatpush.msra.mxu3 %v486_v2  ;;  %601 = vmatpush.msra.mxu1 %v486_v2  ;;  %v467_v7 = vld [vmem:[#allocation2 + $0x60] sm:$0xff]  ;;  %v466_v9 = vld [vmem:[#allocation2 + $0x58] sm:$0xff]  ;;  %v465_v11 = vld [vmem:[#allocation2 + $0x50] sm:$0xff] }
  0xe8   : > { %1278 = vmatpush.msra.mxu2 %v469_v3  ;;  %v483_v8 = vld [vmem:[#allocation2 + $0xe0] sm:$0xff]  ;;  %537 = vmatpush.msra.mxu0 %v469_v3  ;;  %v482_v10 = vld [vmem:[#allocation2 + $0xd8] sm:$0xff]  ;;  %v481_v12 = vld [vmem:[#allocation2 + $0xd0] sm:$0xff] }
  0xe9   : > { %1294 = vmatpush.msra.mxu3 %v485_v4  ;;  %602 = vmatpush.msra.mxu1 %v485_v4  ;;  %v464_v13 = vld [vmem:[#allocation2 + $0x48] sm:$0xff]  ;;  %v463_v15 = vld [vmem:[#allocation2 + $0x40] sm:$0xff]  ;;  %v462_v17 = vld [vmem:[#allocation2 + $0x38] sm:$0xff] }
  0xea   : > { %1279 = vmatpush.msra.mxu2 %v468_v5  ;;  %538 = vmatpush.msra.mxu0 %v468_v5  ;;  %v480_v14 = vld [vmem:[#allocation2 + $0xc8] sm:$0xff]  ;;  %v479_v16 = vld [vmem:[#allocation2 + $0xc0] sm:$0xff]  ;;  %v478_v18 = vld [vmem:[#allocation2 + $0xb8] sm:$0xff] }
  0xeb   : > { %1295 = vmatpush.msra.mxu3 %v484_v6  ;;  %603 = vmatpush.msra.mxu1 %v484_v6  ;;  %v461_v19 = vld [vmem:[#allocation2 + $0x30] sm:$0xff]  ;;  %v460_v21 = vld [vmem:[#allocation2 + $0x28] sm:$0xff]  ;;  %v459_v23 = vld [vmem:[#allocation2 + $0x20] sm:$0xff] }
  0xec   : > { %1280 = vmatpush.msra.mxu2 %v467_v7  ;;  %539 = vmatpush.msra.mxu0 %v467_v7  ;;  %v477_v20 = vld [vmem:[#allocation2 + $0xb0] sm:$0xff]  ;;  %v476_v22 = vld [vmem:[#allocation2 + $0xa8] sm:$0xff]  ;;  %v475_v24 = vld [vmem:[#allocation2 + $0xa0] sm:$0xff] }
  0xed   : > { %1296 = vmatpush.msra.mxu3 %v483_v8  ;;  %604 = vmatpush.msra.mxu1 %v483_v8  ;;  %v458_v25 = vld [vmem:[#allocation2 + $0x18] sm:$0xff]  ;;  %v457_v27 = vld [vmem:[#allocation2 + $0x10] sm:$0xff]  ;;  %v456_v29 = vld [vmem:[#allocation2 + $0x8] sm:$0xff] }
  0xee   : > { %1281 = vmatpush.msra.mxu2 %v466_v9  ;;  %540 = vmatpush.msra.mxu0 %v466_v9  ;;  %v474_v26 = vld [vmem:[#allocation2 + $0x98] sm:$0xff]  ;;  %v473_v28 = vld [vmem:[#allocation2 + $0x90] sm:$0xff]  ;;  %v472_v30 = vld [vmem:[#allocation2 + $0x88] sm:$0xff] }
  0xef   : > { %1297 = vmatpush.msra.mxu3 %v482_v10  ;;  %605 = vmatpush.msra.mxu1 %v482_v10  ;;  %v455_v31 = vld [vmem:[#allocation2] sm:$0xff]  ;;  %v521_v34 = vld [vmem:[%s1590_s16 + $0x88] sm:$0xff]  ;;  %v522_v37 = vld [vmem:[%s1590_s16 + $0x90] sm:$0xff] }
  0xf0   : > { %1282 = vmatpush.msra.mxu2 %v465_v11  ;;  %541 = vmatpush.msra.mxu0 %v465_v11  ;;  %v471_v32 = vld [vmem:[#allocation2 + $0x80] sm:$0xff]  ;;  %v505_v36 = vld [vmem:[%s1590_s16 + $0x8] sm:$0xff]  ;;  %v523_v38 = vld [vmem:[%s1590_s16 + $0x98] sm:$0xff] }
  0xf1   : > { %1298 = vmatpush.msra.mxu3 %v481_v12  ;;  %606 = vmatpush.msra.mxu1 %v481_v12  ;;  %v520_v33 = vld [vmem:[%s1590_s16 + $0x80] sm:$0xff]  ;;  %v506_v39 = vld [vmem:[%s1590_s16 + $0x10] sm:$0xff]  ;;  %v507_v40 = vld [vmem:[%s1590_s16 + $0x18] sm:$0xff] }
  0xf2   : > { %1283 = vmatpush.msra.mxu2 %v464_v13  ;;  %542 = vmatpush.msra.mxu0 %v464_v13  ;;  %v504_v35 = vld [vmem:[%s1590_s16] sm:$0xff]  ;;  %v525_v42 = vld [vmem:[%s1590_s16 + $0xa8] sm:$0xff]  ;;  %v526_v45 = vld [vmem:[%s1590_s16 + $0xb0] sm:$0xff] }
  0xf3   : > { %1299 = vmatpush.msra.mxu3 %v480_v14  ;;  %607 = vmatpush.msra.mxu1 %v480_v14  ;;  %v524_v41 = vld [vmem:[%s1590_s16 + $0xa0] sm:$0xff]  ;;  %v509_v44 = vld [vmem:[%s1590_s16 + $0x28] sm:$0xff]  ;;  %v527_v46 = vld [vmem:[%s1590_s16 + $0xb8] sm:$0xff] }
  0xf4   : > { %1284 = vmatpush.msra.mxu2 %v463_v15  ;;  %543 = vmatpush.msra.mxu0 %v463_v15  ;;  %v508_v43 = vld [vmem:[%s1590_s16 + $0x20] sm:$0xff]  ;;  %v510_v47 = vld [vmem:[%s1590_s16 + $0x30] sm:$0xff]  ;;  %v511_v48 = vld [vmem:[%s1590_s16 + $0x38] sm:$0xff] }
  0xf5   : > { %1300 = vmatpush.msra.mxu3 %v479_v16  ;;  %608 = vmatpush.msra.mxu1 %v479_v16  ;;  %v528_v49 = vld [vmem:[%s1590_s16 + $0xc0] sm:$0xff]  ;;  %v529_v50 = vld [vmem:[%s1590_s16 + $0xc8] sm:$0xff]  ;;  %v530_v53 = vld [vmem:[%s1590_s16 + $0xd0] sm:$0xff] }
  0xf6   : > { %1285 = vmatpush.msra.mxu2 %v462_v17  ;;  %544 = vmatpush.msra.mxu0 %v462_v17  ;;  %v512_v51 = vld [vmem:[%s1590_s16 + $0x40] sm:$0xff]  ;;  %v513_v52 = vld [vmem:[%s1590_s16 + $0x48] sm:$0xff]  ;;  %v531_v54 = vld [vmem:[%s1590_s16 + $0xd8] sm:$0xff] }
  0xf7   : > { %1301 = vmatpush.msra.mxu3 %v478_v18  ;;  %609 = vmatpush.msra.mxu1 %v478_v18  ;;  %v514_v55 = vld [vmem:[%s1590_s16 + $0x50] sm:$0xff]  ;;  %v515_v56 = vld [vmem:[%s1590_s16 + $0x58] sm:$0xff]  ;;  %v532_v57 = vld [vmem:[%s1590_s16 + $0xe0] sm:$0xff] }
  0xf8   : > { %1286 = vmatpush.msra.mxu2 %v461_v19  ;;  %545 = vmatpush.msra.mxu0 %v461_v19  ;;  %v533_v58 = vld [vmem:[%s1590_s16 + $0xe8] sm:$0xff]  ;;  %v516_v59 = vld [vmem:[%s1590_s16 + $0x60] sm:$0xff]  ;;  %v534_v61 = vld [vmem:[%s1590_s16 + $0xf0] sm:$0xff] }
  0xf9   : > { %1302 = vmatpush.msra.mxu3 %v477_v20  ;;  %610 = vmatpush.msra.mxu1 %v477_v20  ;;  %v517_v60 = vld [vmem:[%s1590_s16 + $0x68] sm:$0xff]  ;;  %v535_v62 = vld [vmem:[%s1590_s16 + $0xf8] sm:$0xff]  ;;  %v518_v63 = vld [vmem:[%s1590_s16 + $0x70] sm:$0xff] }
  0xfa   : > { %1287 = vmatpush.msra.mxu2 %v460_v21  ;;  %546 = vmatpush.msra.mxu0 %v460_v21  ;;  %v519_v0 = vld [vmem:[%s1590_s16 + $0x78] sm:$0xff]  ;;  %v488_v4 = vld [vmem:[%s1725_s15] sm:$0xff]  ;;  %v489_v16 = vld [vmem:[%s1725_s15 + $0x8] sm:$0xff] }
  0xfb   : > { %1303 = vmatpush.msra.mxu3 %v476_v22  ;;  %611 = vmatpush.msra.mxu1 %v476_v22  ;;  %v496_v10 = vld [vmem:[%s1725_s15 + $0x40] sm:$0xff]  ;;  %v497_v22 = vld [vmem:[%s1725_s15 + $0x48] sm:$0xff] }
  0xfc   : > { %1288 = vmatpush.msra.mxu2 %v459_v23  ;;  %547 = vmatpush.msra.mxu0 %v459_v23 }
  0xfd   : > { %1304 = vmatpush.msra.mxu3 %v475_v24  ;;  %612 = vmatpush.msra.mxu1 %v475_v24 }
  0xfe   : > { %1289 = vmatpush.msra.mxu2 %v458_v25  ;;  %548 = vmatpush.msra.mxu0 %v458_v25 }
  0xff   : > { %1305 = vmatpush.msra.mxu3 %v474_v26  ;;  %613 = vmatpush.msra.mxu1 %v474_v26 }
 0x100   : > { %1290 = vmatpush.msra.mxu2 %v457_v27  ;;  %549 = vmatpush.msra.mxu0 %v457_v27 }
 0x101   : > { %1306 = vmatpush.msra.mxu3 %v473_v28  ;;  %614 = vmatpush.msra.mxu1 %v473_v28  ;;  %v490_v28 = vld [vmem:[%s1725_s15 + $0x10] sm:$0xff] }
 0x102   : > { %1291 = vmatpush.msra.mxu2 %v456_v29  ;;  %550 = vmatpush.msra.mxu0 %v456_v29 }
 0x103   : > { %1307 = vmatpush.msra.mxu3 %v472_v30  ;;  %615 = vmatpush.msra.mxu1 %v472_v30 }
 0x104   : > { %1292 = vmatpush.msra.mxu2 %v455_v31  ;;  %551 = vmatpush.msra.mxu0 %v455_v31 }
 0x105   : > { %1308 = vmatpush.msra.mxu3 %v471_v32  ;;  %576 = vmatmul.f32.vlgmr.msra.gmra.mxu2 %v520_v33 }
 0x106   : > { %641 = vmatmul.f32.vlgmr.msra.gmra.mxu3 %v521_v34  ;;  %616 = vmatpush.msra.mxu1 %v471_v32  ;;  %v498_v34 = vld [vmem:[%s1725_s15 + $0x50] sm:$0xff] }
 0x107   : > { %552 = vmatmul.f32.vlgmr.msra.gmra.mxu0 %v504_v35  ;;  %617 = vmatmul.f32.vlgmr.msra.gmra.mxu1 %v505_v36 }
 0x10d   : > { %579 = vmatmul.f32.gmra.mxu2 %v522_v37 }
 0x10e   : > { %644 = vmatmul.f32.gmra.mxu3 %v523_v38 }
 0x10f   : > { %555 = vmatmul.f32.gmra.mxu0 %v506_v39  ;;  %620 = vmatmul.f32.gmra.mxu1 %v507_v40  ;;  %v491_v40 = vld [vmem:[%s1725_s15 + $0x18] sm:$0xff] }
 0x115   : > { %582 = vmatmul.f32.gmra.mxu2 %v524_v41 }
 0x116   : > { %647 = vmatmul.f32.gmra.mxu3 %v525_v42 }
 0x117   : > { %558 = vmatmul.f32.gmra.mxu0 %v508_v43  ;;  %623 = vmatmul.f32.gmra.mxu1 %v509_v44 }
 0x11d   : > { %585 = vmatmul.f32.gmra.mxu2 %v526_v45 }
 0x11e   : > { %650 = vmatmul.f32.gmra.mxu3 %v527_v46  ;;  %v499_v46 = vld [vmem:[%s1725_s15 + $0x58] sm:$0xff] }
 0x11f   : > { %561 = vmatmul.f32.gmra.mxu0 %v510_v47  ;;  %626 = vmatmul.f32.gmra.mxu1 %v511_v48 }
 0x125   : > { %588 = vmatmul.f32.gmra.mxu2 %v528_v49 }
 0x126   : > { %653 = vmatmul.f32.gmra.mxu3 %v529_v50 }
 0x127   : > { %564 = vmatmul.f32.gmra.mxu0 %v512_v51  ;;  %629 = vmatmul.f32.gmra.mxu1 %v513_v52  ;;  %v492_v52 = vld [vmem:[%s1725_s15 + $0x20] sm:$0xff] }
 0x12d   : > { %591 = vmatmul.f32.gmra.mxu2 %v530_v53 }
 0x12e   : > { %656 = vmatmul.f32.gmra.mxu3 %v531_v54 }
 0x12f   : > { %567 = vmatmul.f32.gmra.mxu0 %v514_v55  ;;  %632 = vmatmul.f32.gmra.mxu1 %v515_v56 }
 0x135   : > { %594 = vmatmul.f32.gmra.mxu2 %v532_v57 }
 0x136   : > { %659 = vmatmul.f32.gmra.mxu3 %v533_v58  ;;  %v500_v58 = vld [vmem:[%s1725_s15 + $0x60] sm:$0xff] }
 0x137   : > { %570 = vmatmul.f32.gmra.mxu0 %v516_v59  ;;  %635 = vmatmul.f32.gmra.mxu1 %v517_v60 }
 0x13d   : > { %597 = vmatmul.f32.gmra.mxu2 %v534_v61 }
 0x13e   : > { %662 = vmatmul.f32.gmra.mxu3 %v535_v62 }
 0x13f   : > { %573 = vmatmul.f32.gmra.mxu0 %v518_v63  ;;  %638 = vmatmul.f32.gmra.mxu1 %v519_v0  ;;  %v493_v0 = vld [vmem:[%s1725_s15 + $0x28] sm:$0xff] }
 0x184   : > { %v553_v1 = vpop.f32.mrf.mxu0  ;;  %v618_v2 = vpop.f32.mrf.mxu1 }
 0x185   : > { %v619_v3 = vadd.f32 %v618_v2, %v553_v1 }
 0x187   : > { %v666_v5 = vmul.f32 0.1, %v619_v3 }
 0x188   : > { %v577_v6 = vpop.f32.mrf.mxu2 }
 0x189   : > { %v642_v7 = vpop.f32.mrf.mxu3  ;;  %v682_v8 = vsub.f32 %v488_v4, %v666_v5 }
 0x18a   : > { %v643_v9 = vadd.f32 %v642_v7, %v577_v6  ;;  %v501_v6 = vld [vmem:[%s1725_s15 + $0x68] sm:$0xff] }
 0x18b   : > { %699 = vst [vmem:[%s1730_s17] sm:$0xff] %v682_v8 }
 0x18c   : > { %v674_v11 = vmul.f32 0.1, %v643_v9  ;;  %v556_v12 = vpop.f32.mrf.mxu0  ;;  %v621_v13 = vpop.f32.mrf.mxu1 }
 0x18d   : > { %v622_v15 = vadd.f32 %v621_v13, %v556_v12  ;;  %v494_v12 = vld [vmem:[%s1725_s15 + $0x30] sm:$0xff] }
 0x18e   : > { %v690_v14 = vsub.f32 %v496_v10, %v674_v11 }
 0x18f   : > { %v667_v17 = vmul.f32 0.1, %v622_v15 }
 0x190   : > { %707 = vst [vmem:[%s1730_s17 + $0x40] sm:$0xff] %v690_v14  ;;  %v580_v18 = vpop.f32.mrf.mxu2 }
 0x191   : > { %v645_v19 = vpop.f32.mrf.mxu3  ;;  %v683_v20 = vsub.f32 %v489_v16, %v667_v17 }
 0x192   : > { %v646_v21 = vadd.f32 %v645_v19, %v580_v18  ;;  %v502_v18 = vld [vmem:[%s1725_s15 + $0x70] sm:$0xff] }
 0x193   : > { %700 = vst [vmem:[%s1730_s17 + $0x8] sm:$0xff] %v683_v20 }
 0x194   : > { %v675_v23 = vmul.f32 0.1, %v646_v21  ;;  %v559_v24 = vpop.f32.mrf.mxu0  ;;  %v624_v25 = vpop.f32.mrf.mxu1 }
 0x195   : > { %v625_v27 = vadd.f32 %v624_v25, %v559_v24  ;;  %v495_v24 = vld [vmem:[%s1725_s15 + $0x38] sm:$0xff] }
 0x196   : > { %v691_v26 = vsub.f32 %v497_v22, %v675_v23 }
 0x197   : > { %v668_v29 = vmul.f32 0.1, %v625_v27 }
 0x198   : > { %708 = vst [vmem:[%s1730_s17 + $0x48] sm:$0xff] %v691_v26  ;;  %v583_v30 = vpop.f32.mrf.mxu2 }
 0x199   : > { %v648_v31 = vpop.f32.mrf.mxu3  ;;  %v684_v32 = vsub.f32 %v490_v28, %v668_v29 }
 0x19a   : > { %v649_v33 = vadd.f32 %v648_v31, %v583_v30  ;;  %v503_v30 = vld [vmem:[%s1725_s15 + $0x78] sm:$0xff] }
 0x19b   : > { %701 = vst [vmem:[%s1730_s17 + $0x10] sm:$0xff] %v684_v32 }
 0x19c   : > { %v676_v35 = vmul.f32 0.1, %v649_v33  ;;  %v562_v36 = vpop.f32.mrf.mxu0  ;;  %v627_v37 = vpop.f32.mrf.mxu1 }
 0x19d   : > { %v628_v39 = vadd.f32 %v627_v37, %v562_v36 }
 0x19e   : > { %v692_v38 = vsub.f32 %v498_v34, %v676_v35 }
 0x19f   : > { %v669_v41 = vmul.f32 0.1, %v628_v39 }
 0x1a0   : > { %709 = vst [vmem:[%s1730_s17 + $0x50] sm:$0xff] %v692_v38  ;;  %v586_v42 = vpop.f32.mrf.mxu2 }
 0x1a1   : > { %v651_v43 = vpop.f32.mrf.mxu3  ;;  %v685_v44 = vsub.f32 %v491_v40, %v669_v41 }
 0x1a2   : > { %v652_v45 = vadd.f32 %v651_v43, %v586_v42 }
 0x1a3   : > { %702 = vst [vmem:[%s1730_s17 + $0x18] sm:$0xff] %v685_v44 }
 0x1a4   : > { %v677_v47 = vmul.f32 0.1, %v652_v45  ;;  %v565_v48 = vpop.f32.mrf.mxu0  ;;  %v630_v49 = vpop.f32.mrf.mxu1 }
 0x1a5   : > { %v631_v51 = vadd.f32 %v630_v49, %v565_v48 }
 0x1a6   : > { %v693_v50 = vsub.f32 %v499_v46, %v677_v47 }
 0x1a7   : > { %v670_v53 = vmul.f32 0.1, %v631_v51 }
 0x1a8   : > { %710 = vst [vmem:[%s1730_s17 + $0x58] sm:$0xff] %v693_v50  ;;  %v589_v54 = vpop.f32.mrf.mxu2 }
 0x1a9   : > { %v654_v55 = vpop.f32.mrf.mxu3  ;;  %v686_v56 = vsub.f32 %v492_v52, %v670_v53 }
 0x1aa   : > { %v655_v57 = vadd.f32 %v654_v55, %v589_v54 }
 0x1ab   : > { %703 = vst [vmem:[%s1730_s17 + $0x20] sm:$0xff] %v686_v56 }
 0x1ac   : > { %v678_v59 = vmul.f32 0.1, %v655_v57  ;;  %v568_v60 = vpop.f32.mrf.mxu0  ;;  %v633_v61 = vpop.f32.mrf.mxu1 }
 0x1ad   : > { %v634_v63 = vadd.f32 %v633_v61, %v568_v60 }
 0x1ae   : > { %v694_v62 = vsub.f32 %v500_v58, %v678_v59 }
 0x1af   : > { %v671_v1 = vmul.f32 0.1, %v634_v63 }
 0x1b0   : > { %711 = vst [vmem:[%s1730_s17 + $0x60] sm:$0xff] %v694_v62  ;;  %v592_v2 = vpop.f32.mrf.mxu2 }
 0x1b1   : > { %v657_v3 = vpop.f32.mrf.mxu3  ;;  %v687_v4 = vsub.f32 %v493_v0, %v671_v1 }
 0x1b2   : > { %v658_v5 = vadd.f32 %v657_v3, %v592_v2 }
 0x1b3   : > { %704 = vst [vmem:[%s1730_s17 + $0x28] sm:$0xff] %v687_v4 }
 0x1b4   : > { %v679_v7 = vmul.f32 0.1, %v658_v5  ;;  %v571_v8 = vpop.f32.mrf.mxu0  ;;  %v636_v9 = vpop.f32.mrf.mxu1 }
 0x1b5   : > { %v637_v11 = vadd.f32 %v636_v9, %v571_v8 }
 0x1b6   : > { %v695_v10 = vsub.f32 %v501_v6, %v679_v7 }
 0x1b7   : > { %v672_v13 = vmul.f32 0.1, %v637_v11 }
 0x1b8   : > { %712 = vst [vmem:[%s1730_s17 + $0x68] sm:$0xff] %v695_v10  ;;  %v595_v14 = vpop.f32.mrf.mxu2 }
 0x1b9   : > { %v660_v15 = vpop.f32.mrf.mxu3  ;;  %v688_v16 = vsub.f32 %v494_v12, %v672_v13 }
 0x1ba   : > { %v661_v17 = vadd.f32 %v660_v15, %v595_v14 }
 0x1bb   : > { %705 = vst [vmem:[%s1730_s17 + $0x30] sm:$0xff] %v688_v16 }
 0x1bc   : > { %v680_v19 = vmul.f32 0.1, %v661_v17  ;;  %v574_v20 = vpop.f32.mrf.mxu0  ;;  %v639_v21 = vpop.f32.mrf.mxu1 }
 0x1bd   : > { %v640_v23 = vadd.f32 %v639_v21, %v574_v20 }
 0x1be   : > { %v696_v22 = vsub.f32 %v502_v18, %v680_v19 }
 0x1bf   : > { %v673_v25 = vmul.f32 0.1, %v640_v23 }
 0x1c0   : > { %713 = vst [vmem:[%s1730_s17 + $0x70] sm:$0xff] %v696_v22  ;;  %v598_v26 = vpop.f32.mrf.mxu2 }
 0x1c1   : > { %v663_v27 = vpop.f32.mrf.mxu3  ;;  %v689_v28 = vsub.f32 %v495_v24, %v673_v25 }
 0x1c2   : > { %v664_v29 = vadd.f32 %v663_v27, %v598_v26 }
 0x1c3   : > { %706 = vst [vmem:[%s1730_s17 + $0x38] sm:$0xff] %v689_v28 }
 0x1c4   : > { %v681_v31 = vmul.f32 0.1, %v664_v29 }
 0x1c6   : > { %v697_v32 = vsub.f32 %v503_v30, %v681_v31 }
 0x1c8   : > { %714 = vst [vmem:[%s1730_s17 + $0x78] sm:$0xff] %v697_v32 }
 0x1c9 PF: > { %p715_p0 = scmp.eq.s32.totalorder %s1963_s14, 0 }
 0x1cb   : > { %p716_p1 = pnand %p715_p0, %p303_p6 }
 0x1cc   : > { %s1798_s18 = scalar_lea.vmem (!%p716_p1), [#allocation3], %s1576_s29 }
 0x1cd   : > { %719 = sbr.rel (%p716_p1) target bundleno = 694 (0x2b6), region = 56 }
 0x1d2   : > { %v735_v33 = vld [vmem:[#allocation3 + $0x78] sm:$0xff]  ;;  %v734_v35 = vld [vmem:[#allocation3 + $0x70] sm:$0xff]  ;;  %v733_v37 = vld [vmem:[#allocation3 + $0x68] sm:$0xff] }
 0x1d3   : > { %v751_v34 = vld [vmem:[#allocation3 + $0xf8] sm:$0xff]  ;;  %1309 = vmatpush.msra.mxu2 %v735_v33  ;;  %v750_v36 = vld [vmem:[#allocation3 + $0xf0] sm:$0xff]  ;;  %v749_v38 = vld [vmem:[#allocation3 + $0xe8] sm:$0xff]  ;;  %801 = vmatpush.msra.mxu0 %v735_v33 }
 0x1d4   : > { %1325 = vmatpush.msra.mxu3 %v751_v34  ;;  %866 = vmatpush.msra.mxu1 %v751_v34  ;;  %v732_v39 = vld [vmem:[#allocation3 + $0x60] sm:$0xff]  ;;  %v731_v41 = vld [vmem:[#allocation3 + $0x58] sm:$0xff]  ;;  %v730_v43 = vld [vmem:[#allocation3 + $0x50] sm:$0xff] }
 0x1d5   : > { %1310 = vmatpush.msra.mxu2 %v734_v35  ;;  %v748_v40 = vld [vmem:[#allocation3 + $0xe0] sm:$0xff]  ;;  %802 = vmatpush.msra.mxu0 %v734_v35  ;;  %v747_v42 = vld [vmem:[#allocation3 + $0xd8] sm:$0xff]  ;;  %v746_v44 = vld [vmem:[#allocation3 + $0xd0] sm:$0xff] }
 0x1d6   : > { %1326 = vmatpush.msra.mxu3 %v750_v36  ;;  %867 = vmatpush.msra.mxu1 %v750_v36  ;;  %v729_v45 = vld [vmem:[#allocation3 + $0x48] sm:$0xff]  ;;  %v728_v47 = vld [vmem:[#allocation3 + $0x40] sm:$0xff]  ;;  %v727_v49 = vld [vmem:[#allocation3 + $0x38] sm:$0xff] }
 0x1d7   : > { %1311 = vmatpush.msra.mxu2 %v733_v37  ;;  %803 = vmatpush.msra.mxu0 %v733_v37  ;;  %v745_v46 = vld [vmem:[#allocation3 + $0xc8] sm:$0xff]  ;;  %v744_v48 = vld [vmem:[#allocation3 + $0xc0] sm:$0xff]  ;;  %v743_v50 = vld [vmem:[#allocation3 + $0xb8] sm:$0xff] }
 0x1d8   : > { %1327 = vmatpush.msra.mxu3 %v749_v38  ;;  %868 = vmatpush.msra.mxu1 %v749_v38  ;;  %v726_v51 = vld [vmem:[#allocation3 + $0x30] sm:$0xff]  ;;  %v725_v53 = vld [vmem:[#allocation3 + $0x28] sm:$0xff]  ;;  %v724_v55 = vld [vmem:[#allocation3 + $0x20] sm:$0xff] }
 0x1d9   : > { %1312 = vmatpush.msra.mxu2 %v732_v39  ;;  %804 = vmatpush.msra.mxu0 %v732_v39  ;;  %v742_v52 = vld [vmem:[#allocation3 + $0xb0] sm:$0xff]  ;;  %v741_v54 = vld [vmem:[#allocation3 + $0xa8] sm:$0xff]  ;;  %v740_v56 = vld [vmem:[#allocation3 + $0xa0] sm:$0xff] }
 0x1da   : > { %1328 = vmatpush.msra.mxu3 %v748_v40  ;;  %869 = vmatpush.msra.mxu1 %v748_v40  ;;  %v723_v57 = vld [vmem:[#allocation3 + $0x18] sm:$0xff]  ;;  %v722_v59 = vld [vmem:[#allocation3 + $0x10] sm:$0xff]  ;;  %v721_v61 = vld [vmem:[#allocation3 + $0x8] sm:$0xff] }
 0x1db   : > { %1313 = vmatpush.msra.mxu2 %v731_v41  ;;  %805 = vmatpush.msra.mxu0 %v731_v41  ;;  %v739_v58 = vld [vmem:[#allocation3 + $0x98] sm:$0xff]  ;;  %v738_v60 = vld [vmem:[#allocation3 + $0x90] sm:$0xff]  ;;  %v737_v62 = vld [vmem:[#allocation3 + $0x88] sm:$0xff] }
 0x1dc   : > { %1329 = vmatpush.msra.mxu3 %v747_v42  ;;  %870 = vmatpush.msra.mxu1 %v747_v42  ;;  %v720_v63 = vld [vmem:[#allocation3] sm:$0xff]  ;;  %v786_v2 = vld [vmem:[%s1590_s16 + $0x88] sm:$0xff]  ;;  %v787_v5 = vld [vmem:[%s1590_s16 + $0x90] sm:$0xff] }
 0x1dd   : > { %1314 = vmatpush.msra.mxu2 %v730_v43  ;;  %806 = vmatpush.msra.mxu0 %v730_v43  ;;  %v736_v0 = vld [vmem:[#allocation3 + $0x80] sm:$0xff]  ;;  %v770_v4 = vld [vmem:[%s1590_s16 + $0x8] sm:$0xff]  ;;  %v788_v6 = vld [vmem:[%s1590_s16 + $0x98] sm:$0xff] }
 0x1de   : > { %1330 = vmatpush.msra.mxu3 %v746_v44  ;;  %871 = vmatpush.msra.mxu1 %v746_v44  ;;  %v785_v1 = vld [vmem:[%s1590_s16 + $0x80] sm:$0xff]  ;;  %v771_v7 = vld [vmem:[%s1590_s16 + $0x10] sm:$0xff]  ;;  %v772_v8 = vld [vmem:[%s1590_s16 + $0x18] sm:$0xff] }
 0x1df   : > { %1315 = vmatpush.msra.mxu2 %v729_v45  ;;  %807 = vmatpush.msra.mxu0 %v729_v45  ;;  %v769_v3 = vld [vmem:[%s1590_s16] sm:$0xff]  ;;  %v790_v10 = vld [vmem:[%s1590_s16 + $0xa8] sm:$0xff]  ;;  %v791_v13 = vld [vmem:[%s1590_s16 + $0xb0] sm:$0xff] }
 0x1e0   : > { %1331 = vmatpush.msra.mxu3 %v745_v46  ;;  %872 = vmatpush.msra.mxu1 %v745_v46  ;;  %v789_v9 = vld [vmem:[%s1590_s16 + $0xa0] sm:$0xff]  ;;  %v774_v12 = vld [vmem:[%s1590_s16 + $0x28] sm:$0xff]  ;;  %v792_v14 = vld [vmem:[%s1590_s16 + $0xb8] sm:$0xff] }
 0x1e1   : > { %1316 = vmatpush.msra.mxu2 %v728_v47  ;;  %808 = vmatpush.msra.mxu0 %v728_v47  ;;  %v773_v11 = vld [vmem:[%s1590_s16 + $0x20] sm:$0xff]  ;;  %v775_v15 = vld [vmem:[%s1590_s16 + $0x30] sm:$0xff]  ;;  %v776_v16 = vld [vmem:[%s1590_s16 + $0x38] sm:$0xff] }
 0x1e2   : > { %1332 = vmatpush.msra.mxu3 %v744_v48  ;;  %873 = vmatpush.msra.mxu1 %v744_v48  ;;  %v793_v17 = vld [vmem:[%s1590_s16 + $0xc0] sm:$0xff]  ;;  %v794_v18 = vld [vmem:[%s1590_s16 + $0xc8] sm:$0xff]  ;;  %v795_v21 = vld [vmem:[%s1590_s16 + $0xd0] sm:$0xff] }
 0x1e3   : > { %1317 = vmatpush.msra.mxu2 %v727_v49  ;;  %809 = vmatpush.msra.mxu0 %v727_v49  ;;  %v777_v19 = vld [vmem:[%s1590_s16 + $0x40] sm:$0xff]  ;;  %v778_v20 = vld [vmem:[%s1590_s16 + $0x48] sm:$0xff]  ;;  %v796_v22 = vld [vmem:[%s1590_s16 + $0xd8] sm:$0xff] }
 0x1e4   : > { %1333 = vmatpush.msra.mxu3 %v743_v50  ;;  %874 = vmatpush.msra.mxu1 %v743_v50  ;;  %v779_v23 = vld [vmem:[%s1590_s16 + $0x50] sm:$0xff]  ;;  %v780_v24 = vld [vmem:[%s1590_s16 + $0x58] sm:$0xff]  ;;  %v797_v25 = vld [vmem:[%s1590_s16 + $0xe0] sm:$0xff] }
 0x1e5   : > { %1318 = vmatpush.msra.mxu2 %v726_v51  ;;  %810 = vmatpush.msra.mxu0 %v726_v51  ;;  %v798_v26 = vld [vmem:[%s1590_s16 + $0xe8] sm:$0xff]  ;;  %v781_v27 = vld [vmem:[%s1590_s16 + $0x60] sm:$0xff]  ;;  %v799_v29 = vld [vmem:[%s1590_s16 + $0xf0] sm:$0xff] }
 0x1e6   : > { %1334 = vmatpush.msra.mxu3 %v742_v52  ;;  %875 = vmatpush.msra.mxu1 %v742_v52  ;;  %v782_v28 = vld [vmem:[%s1590_s16 + $0x68] sm:$0xff]  ;;  %v800_v30 = vld [vmem:[%s1590_s16 + $0xf8] sm:$0xff]  ;;  %v783_v31 = vld [vmem:[%s1590_s16 + $0x70] sm:$0xff] }
 0x1e7   : > { %1319 = vmatpush.msra.mxu2 %v725_v53  ;;  %811 = vmatpush.msra.mxu0 %v725_v53  ;;  %v784_v32 = vld [vmem:[%s1590_s16 + $0x78] sm:$0xff]  ;;  %v753_v36 = vld [vmem:[%s1798_s18] sm:$0xff]  ;;  %s1803_s16 = scalar_lea.vmem [#allocation2], %s1576_s29  ;;  %v754_v48 = vld [vmem:[%s1798_s18 + $0x8] sm:$0xff] }
 0x1e8   : > { %1335 = vmatpush.msra.mxu3 %v741_v54  ;;  %876 = vmatpush.msra.mxu1 %v741_v54  ;;  %v761_v42 = vld [vmem:[%s1798_s18 + $0x40] sm:$0xff]  ;;  %v762_v54 = vld [vmem:[%s1798_s18 + $0x48] sm:$0xff] }
 0x1e9   : > { %1320 = vmatpush.msra.mxu2 %v724_v55  ;;  %812 = vmatpush.msra.mxu0 %v724_v55 }
 0x1ea   : > { %1336 = vmatpush.msra.mxu3 %v740_v56  ;;  %877 = vmatpush.msra.mxu1 %v740_v56 }
 0x1eb   : > { %1321 = vmatpush.msra.mxu2 %v723_v57  ;;  %813 = vmatpush.msra.mxu0 %v723_v57 }
 0x1ec   : > { %1337 = vmatpush.msra.mxu3 %v739_v58  ;;  %878 = vmatpush.msra.mxu1 %v739_v58 }
 0x1ed   : > { %1322 = vmatpush.msra.mxu2 %v722_v59  ;;  %814 = vmatpush.msra.mxu0 %v722_v59 }
 0x1ee   : > { %1338 = vmatpush.msra.mxu3 %v738_v60  ;;  %879 = vmatpush.msra.mxu1 %v738_v60  ;;  %v755_v60 = vld [vmem:[%s1798_s18 + $0x10] sm:$0xff] }
 0x1ef   : > { %1323 = vmatpush.msra.mxu2 %v721_v61  ;;  %815 = vmatpush.msra.mxu0 %v721_v61 }
 0x1f0   : > { %1339 = vmatpush.msra.mxu3 %v737_v62  ;;  %880 = vmatpush.msra.mxu1 %v737_v62 }
 0x1f1   : > { %1324 = vmatpush.msra.mxu2 %v720_v63  ;;  %816 = vmatpush.msra.mxu0 %v720_v63 }
 0x1f2   : > { %1340 = vmatpush.msra.mxu3 %v736_v0  ;;  %841 = vmatmul.f32.vlgmr.msra.gmra.mxu2 %v785_v1 }
 0x1f3   : > { %906 = vmatmul.f32.vlgmr.msra.gmra.mxu3 %v786_v2  ;;  %881 = vmatpush.msra.mxu1 %v736_v0  ;;  %v763_v2 = vld [vmem:[%s1798_s18 + $0x50] sm:$0xff] }
 0x1f4   : > { %817 = vmatmul.f32.vlgmr.msra.gmra.mxu0 %v769_v3  ;;  %882 = vmatmul.f32.vlgmr.msra.gmra.mxu1 %v770_v4 }
 0x1fa   : > { %844 = vmatmul.f32.gmra.mxu2 %v787_v5 }
 0x1fb   : > { %909 = vmatmul.f32.gmra.mxu3 %v788_v6 }
 0x1fc   : > { %820 = vmatmul.f32.gmra.mxu0 %v771_v7  ;;  %885 = vmatmul.f32.gmra.mxu1 %v772_v8  ;;  %v756_v8 = vld [vmem:[%s1798_s18 + $0x18] sm:$0xff] }
 0x202   : > { %847 = vmatmul.f32.gmra.mxu2 %v789_v9 }
 0x203   : > { %912 = vmatmul.f32.gmra.mxu3 %v790_v10 }
 0x204   : > { %823 = vmatmul.f32.gmra.mxu0 %v773_v11  ;;  %888 = vmatmul.f32.gmra.mxu1 %v774_v12 }
 0x20a   : > { %850 = vmatmul.f32.gmra.mxu2 %v791_v13 }
 0x20b   : > { %915 = vmatmul.f32.gmra.mxu3 %v792_v14  ;;  %v764_v14 = vld [vmem:[%s1798_s18 + $0x58] sm:$0xff] }
 0x20c   : > { %826 = vmatmul.f32.gmra.mxu0 %v775_v15  ;;  %891 = vmatmul.f32.gmra.mxu1 %v776_v16 }
 0x212   : > { %853 = vmatmul.f32.gmra.mxu2 %v793_v17 }
 0x213   : > { %918 = vmatmul.f32.gmra.mxu3 %v794_v18 }
 0x214   : > { %829 = vmatmul.f32.gmra.mxu0 %v777_v19  ;;  %894 = vmatmul.f32.gmra.mxu1 %v778_v20  ;;  %v757_v20 = vld [vmem:[%s1798_s18 + $0x20] sm:$0xff] }
 0x21a   : > { %856 = vmatmul.f32.gmra.mxu2 %v795_v21 }
 0x21b   : > { %921 = vmatmul.f32.gmra.mxu3 %v796_v22 }
 0x21c   : > { %832 = vmatmul.f32.gmra.mxu0 %v779_v23  ;;  %897 = vmatmul.f32.gmra.mxu1 %v780_v24 }
 0x222   : > { %859 = vmatmul.f32.gmra.mxu2 %v797_v25 }
 0x223   : > { %924 = vmatmul.f32.gmra.mxu3 %v798_v26  ;;  %v765_v26 = vld [vmem:[%s1798_s18 + $0x60] sm:$0xff] }
 0x224   : > { %835 = vmatmul.f32.gmra.mxu0 %v781_v27  ;;  %900 = vmatmul.f32.gmra.mxu1 %v782_v28 }
 0x22a   : > { %862 = vmatmul.f32.gmra.mxu2 %v799_v29 }
 0x22b   : > { %927 = vmatmul.f32.gmra.mxu3 %v800_v30 }
 0x22c   : > { %838 = vmatmul.f32.gmra.mxu0 %v783_v31  ;;  %903 = vmatmul.f32.gmra.mxu1 %v784_v32  ;;  %v758_v32 = vld [vmem:[%s1798_s18 + $0x28] sm:$0xff] }
 0x271   : > { %v818_v33 = vpop.f32.mrf.mxu0  ;;  %v883_v34 = vpop.f32.mrf.mxu1 }
 0x272   : > { %v884_v35 = vadd.f32 %v883_v34, %v818_v33 }
 0x274   : > { %v931_v37 = vmul.f32 0.1, %v884_v35 }
 0x275   : > { %v842_v38 = vpop.f32.mrf.mxu2 }
 0x276   : > { %v907_v39 = vpop.f32.mrf.mxu3  ;;  %v947_v40 = vsub.f32 %v753_v36, %v931_v37 }
 0x277   : > { %v908_v41 = vadd.f32 %v907_v39, %v842_v38  ;;  %v766_v38 = vld [vmem:[%s1798_s18 + $0x68] sm:$0xff] }
 0x278   : > { %964 = vst [vmem:[%s1803_s16] sm:$0xff] %v947_v40 }
 0x279   : > { %v939_v43 = vmul.f32 0.1, %v908_v41  ;;  %v821_v44 = vpop.f32.mrf.mxu0  ;;  %v886_v45 = vpop.f32.mrf.mxu1 }
 0x27a   : > { %v887_v47 = vadd.f32 %v886_v45, %v821_v44  ;;  %v759_v44 = vld [vmem:[%s1798_s18 + $0x30] sm:$0xff] }
 0x27b   : > { %v955_v46 = vsub.f32 %v761_v42, %v939_v43 }
 0x27c   : > { %v932_v49 = vmul.f32 0.1, %v887_v47 }
 0x27d   : > { %972 = vst [vmem:[%s1803_s16 + $0x40] sm:$0xff] %v955_v46  ;;  %v845_v50 = vpop.f32.mrf.mxu2 }
 0x27e   : > { %v910_v51 = vpop.f32.mrf.mxu3  ;;  %v948_v52 = vsub.f32 %v754_v48, %v932_v49 }
 0x27f   : > { %v911_v53 = vadd.f32 %v910_v51, %v845_v50  ;;  %v767_v50 = vld [vmem:[%s1798_s18 + $0x70] sm:$0xff] }
 0x280   : > { %965 = vst [vmem:[%s1803_s16 + $0x8] sm:$0xff] %v948_v52 }
 0x281   : > { %v940_v55 = vmul.f32 0.1, %v911_v53  ;;  %v824_v56 = vpop.f32.mrf.mxu0  ;;  %v889_v57 = vpop.f32.mrf.mxu1 }
 0x282   : > { %v890_v59 = vadd.f32 %v889_v57, %v824_v56  ;;  %v760_v56 = vld [vmem:[%s1798_s18 + $0x38] sm:$0xff] }
 0x283   : > { %v956_v58 = vsub.f32 %v762_v54, %v940_v55 }
 0x284   : > { %v933_v61 = vmul.f32 0.1, %v890_v59 }
 0x285   : > { %973 = vst [vmem:[%s1803_s16 + $0x48] sm:$0xff] %v956_v58  ;;  %v848_v62 = vpop.f32.mrf.mxu2 }
 0x286   : > { %v913_v63 = vpop.f32.mrf.mxu3  ;;  %v949_v0 = vsub.f32 %v755_v60, %v933_v61 }
 0x287   : > { %v914_v1 = vadd.f32 %v913_v63, %v848_v62  ;;  %v768_v62 = vld [vmem:[%s1798_s18 + $0x78] sm:$0xff] }
 0x288   : > { %966 = vst [vmem:[%s1803_s16 + $0x10] sm:$0xff] %v949_v0 }
 0x289   : > { %v941_v3 = vmul.f32 0.1, %v914_v1  ;;  %v827_v4 = vpop.f32.mrf.mxu0  ;;  %v892_v5 = vpop.f32.mrf.mxu1 }
 0x28a   : > { %v893_v7 = vadd.f32 %v892_v5, %v827_v4 }
 0x28b   : > { %v957_v6 = vsub.f32 %v763_v2, %v941_v3 }
 0x28c   : > { %v934_v9 = vmul.f32 0.1, %v893_v7 }
 0x28d   : > { %974 = vst [vmem:[%s1803_s16 + $0x50] sm:$0xff] %v957_v6  ;;  %v851_v10 = vpop.f32.mrf.mxu2 }
 0x28e   : > { %v916_v11 = vpop.f32.mrf.mxu3  ;;  %v950_v12 = vsub.f32 %v756_v8, %v934_v9 }
 0x28f   : > { %v917_v13 = vadd.f32 %v916_v11, %v851_v10 }
 0x290   : > { %967 = vst [vmem:[%s1803_s16 + $0x18] sm:$0xff] %v950_v12 }
 0x291   : > { %v942_v15 = vmul.f32 0.1, %v917_v13  ;;  %v830_v16 = vpop.f32.mrf.mxu0  ;;  %v895_v17 = vpop.f32.mrf.mxu1 }
 0x292   : > { %v896_v19 = vadd.f32 %v895_v17, %v830_v16 }
 0x293   : > { %v958_v18 = vsub.f32 %v764_v14, %v942_v15 }
 0x294   : > { %v935_v21 = vmul.f32 0.1, %v896_v19 }
 0x295   : > { %975 = vst [vmem:[%s1803_s16 + $0x58] sm:$0xff] %v958_v18  ;;  %v854_v22 = vpop.f32.mrf.mxu2 }
 0x296   : > { %v919_v23 = vpop.f32.mrf.mxu3  ;;  %v951_v24 = vsub.f32 %v757_v20, %v935_v21 }
 0x297   : > { %v920_v25 = vadd.f32 %v919_v23, %v854_v22 }
 0x298   : > { %968 = vst [vmem:[%s1803_s16 + $0x20] sm:$0xff] %v951_v24 }
 0x299   : > { %v943_v27 = vmul.f32 0.1, %v920_v25  ;;  %v833_v28 = vpop.f32.mrf.mxu0  ;;  %v898_v29 = vpop.f32.mrf.mxu1 }
 0x29a   : > { %v899_v31 = vadd.f32 %v898_v29, %v833_v28 }
 0x29b   : > { %v959_v30 = vsub.f32 %v765_v26, %v943_v27 }
 0x29c   : > { %v936_v33 = vmul.f32 0.1, %v899_v31 }
 0x29d   : > { %976 = vst [vmem:[%s1803_s16 + $0x60] sm:$0xff] %v959_v30  ;;  %v857_v34 = vpop.f32.mrf.mxu2 }
 0x29e   : > { %v922_v35 = vpop.f32.mrf.mxu3  ;;  %v952_v36 = vsub.f32 %v758_v32, %v936_v33 }
 0x29f   : > { %v923_v37 = vadd.f32 %v922_v35, %v857_v34 }
 0x2a0   : > { %969 = vst [vmem:[%s1803_s16 + $0x28] sm:$0xff] %v952_v36 }
 0x2a1   : > { %v944_v39 = vmul.f32 0.1, %v923_v37  ;;  %v836_v40 = vpop.f32.mrf.mxu0  ;;  %v901_v41 = vpop.f32.mrf.mxu1 }
 0x2a2   : > { %v902_v43 = vadd.f32 %v901_v41, %v836_v40 }
 0x2a3   : > { %v960_v42 = vsub.f32 %v766_v38, %v944_v39 }
 0x2a4   : > { %v937_v45 = vmul.f32 0.1, %v902_v43 }
 0x2a5   : > { %977 = vst [vmem:[%s1803_s16 + $0x68] sm:$0xff] %v960_v42  ;;  %v860_v46 = vpop.f32.mrf.mxu2 }
 0x2a6   : > { %v925_v47 = vpop.f32.mrf.mxu3  ;;  %v953_v48 = vsub.f32 %v759_v44, %v937_v45 }
 0x2a7   : > { %v926_v49 = vadd.f32 %v925_v47, %v860_v46 }
 0x2a8   : > { %970 = vst [vmem:[%s1803_s16 + $0x30] sm:$0xff] %v953_v48 }
 0x2a9   : > { %v945_v51 = vmul.f32 0.1, %v926_v49  ;;  %v839_v52 = vpop.f32.mrf.mxu0  ;;  %v904_v53 = vpop.f32.mrf.mxu1 }
 0x2aa   : > { %v905_v55 = vadd.f32 %v904_v53, %v839_v52 }
 0x2ab   : > { %v961_v54 = vsub.f32 %v767_v50, %v945_v51 }
 0x2ac   : > { %v938_v57 = vmul.f32 0.1, %v905_v55 }
 0x2ad   : > { %978 = vst [vmem:[%s1803_s16 + $0x70] sm:$0xff] %v961_v54  ;;  %v863_v58 = vpop.f32.mrf.mxu2 }
 0x2ae   : > { %v928_v59 = vpop.f32.mrf.mxu3  ;;  %v954_v60 = vsub.f32 %v760_v56, %v938_v57 }
 0x2af   : > { %v929_v61 = vadd.f32 %v928_v59, %v863_v58 }
 0x2b0   : > { %971 = vst [vmem:[%s1803_s16 + $0x38] sm:$0xff] %v954_v60 }
 0x2b1   : > { %v946_v63 = vmul.f32 0.1, %v929_v61 }
 0x2b3   : > { %v962_v0 = vsub.f32 %v768_v62, %v946_v63 }
 0x2b5   : > { %979 = vst [vmem:[%s1803_s16 + $0x78] sm:$0xff] %v962_v0 }
 0x2b6 PF: > { %p1225_p2 = scmp.ne.s32.totalorder %s1489_s22, 2 }
 0x2b7   : > { %s1870_s9 = scalar_lea.vmem (!%p1225_p2), [#allocation2], %s1576_s29 }
 0x2b8   : > { %983 = sbr.rel (%p1225_p2) target bundleno = 893 (0x37d), region = 60 }
 0x2bd   : > { %v1032_v1 = vld [vmem:[%s1941_s4 + $0x78] sm:$0xff]  ;;  %v1031_v2 = vld [vmem:[%s1941_s4 + $0x70] sm:$0xff]  ;;  %v1030_v3 = vld [vmem:[%s1941_s4 + $0x68] sm:$0xff] }
 0x2be   : > { %1342 = vmatpush.msra.mxu2 %v1032_v1  ;;  %1343 = vmatpush.msra.mxu3 %v1032_v1  ;;  %v1029_v4 = vld [vmem:[%s1941_s4 + $0x60] sm:$0xff]  ;;  %v1028_v5 = vld [vmem:[%s1941_s4 + $0x58] sm:$0xff]  ;;  %v1027_v6 = vld [vmem:[%s1941_s4 + $0x50] sm:$0xff] }
 0x2bf   : > { %1037 = vmatpush.msra.mxu0 %v1032_v1  ;;  %1341 = vmatpush.msra.mxu1 %v1032_v1  ;;  %v1026_v7 = vld [vmem:[%s1941_s4 + $0x48] sm:$0xff]  ;;  %v1025_v8 = vld [vmem:[%s1941_s4 + $0x40] sm:$0xff]  ;;  %v1024_v9 = vld [vmem:[%s1941_s4 + $0x38] sm:$0xff] }
 0x2c0   : > { %1345 = vmatpush.msra.mxu2 %v1031_v2  ;;  %1346 = vmatpush.msra.mxu3 %v1031_v2  ;;  %v1023_v10 = vld [vmem:[%s1941_s4 + $0x30] sm:$0xff]  ;;  %v1022_v11 = vld [vmem:[%s1941_s4 + $0x28] sm:$0xff]  ;;  %v993_v12 = vld [vmem:[%s1870_s9 + $0x40] sm:$0xff] }
 0x2c1   : > { %1038 = vmatpush.msra.mxu0 %v1031_v2  ;;  %1344 = vmatpush.msra.mxu1 %v1031_v2  ;;  %v1021_v13 = vld [vmem:[%s1941_s4 + $0x20] sm:$0xff]  ;;  %v1020_v16 = vld [vmem:[%s1941_s4 + $0x18] sm:$0xff]  ;;  %1431 = vtanh.f32 %v993_v12  ;;  %v1019_v18 = vld [vmem:[%s1941_s4 + $0x10] sm:$0xff] }
 0x2c2   : > { %1348 = vmatpush.msra.mxu2 %v1030_v3  ;;  %1349 = vmatpush.msra.mxu3 %v1030_v3  ;;  %v997_v14 = vld [vmem:[%s1870_s9 + $0x60] sm:$0xff]  ;;  %v1018_v19 = vld [vmem:[%s1941_s4 + $0x8] sm:$0xff]  ;;  %v995_v29 = vld [vmem:[%s1870_s9 + $0x50] sm:$0xff] }
 0x2c3   : > { %1039 = vmatpush.msra.mxu0 %v1030_v3  ;;  %1347 = vmatpush.msra.mxu1 %v1030_v3  ;;  %v985_v15 = vld [vmem:[%s1870_s9] sm:$0xff]  ;;  %1433 = vtanh.f32 %v997_v14  ;;  %v994_v20 = vld [vmem:[%s1870_s9 + $0x48] sm:$0xff]  ;;  %v999_v31 = vld [vmem:[%s1870_s9 + $0x70] sm:$0xff] }
 0x2c4   : > { %1351 = vmatpush.msra.mxu2 %v1029_v4  ;;  %1352 = vmatpush.msra.mxu3 %v1029_v4  ;;  %v989_v17 = vld [vmem:[%s1870_s9 + $0x20] sm:$0xff]  ;;  %1435 = vtanh.f32 %v985_v15  ;;  %v998_v23 = vld [vmem:[%s1870_s9 + $0x68] sm:$0xff]  ;;  %v987_v33 = vld [vmem:[%s1870_s9 + $0x10] sm:$0xff] }
 0x2c5   : > { %1040 = vmatpush.msra.mxu0 %v1029_v4  ;;  %1350 = vmatpush.msra.mxu1 %v1029_v4  ;;  %1437 = vtanh.f32 %v989_v17  ;;  %v1017_v22 = vld [vmem:[%s1941_s4] sm:$0xff]  ;;  %v986_v25 = vld [vmem:[%s1870_s9 + $0x8] sm:$0xff]  ;;  %v991_v35 = vld [vmem:[%s1870_s9 + $0x30] sm:$0xff] }
 0x2c6   : > { %1354 = vmatpush.msra.mxu2 %v1028_v5  ;;  %1355 = vmatpush.msra.mxu3 %v1028_v5  ;;  %1439 = vtanh.f32 %v994_v20  ;;  %v990_v27 = vld [vmem:[%s1870_s9 + $0x28] sm:$0xff]  ;;  %v996_v37 = vld [vmem:[%s1870_s9 + $0x58] sm:$0xff]  ;;  %v1430_v49 = vld [vmem:[%s1942_s5] ss:$0 sm:$0xff] }
 0x2c7   : > { %1041 = vmatpush.msra.mxu0 %v1028_v5  ;;  %1353 = vmatpush.msra.mxu1 %v1028_v5  ;;  %v1432_v21 = vpop.eup %1431  ;;  %1441 = vtanh.f32 %v998_v23  ;;  %v1000_v39 = vld [vmem:[%s1870_s9 + $0x78] sm:$0xff] }
 0x2c8   : > { %1357 = vmatpush.msra.mxu2 %v1027_v6  ;;  %1358 = vmatpush.msra.mxu3 %v1027_v6  ;;  %1443 = vtanh.f32 %v986_v25  ;;  %v988_v41 = vld [vmem:[%s1870_s9 + $0x18] sm:$0xff] }
 0x2c9   : > { %1042 = vmatpush.msra.mxu0 %v1027_v6  ;;  %1356 = vmatpush.msra.mxu1 %v1027_v6  ;;  %v1434_v24 = vpop.eup %1433  ;;  %1445 = vtanh.f32 %v990_v27  ;;  %v992_v43 = vld [vmem:[%s1870_s9 + $0x38] sm:$0xff] }
 0x2ca   : > { %1360 = vmatpush.msra.mxu2 %v1026_v7  ;;  %1361 = vmatpush.msra.mxu3 %v1026_v7  ;;  %v1436_v26 = vpop.eup %1435  ;;  %1447 = vtanh.f32 %v995_v29 }
 0x2cb   : > { %1043 = vmatpush.msra.mxu0 %v1026_v7  ;;  %1359 = vmatpush.msra.mxu1 %v1026_v7  ;;  %v1438_v28 = vpop.eup %1437  ;;  %1449 = vtanh.f32 %v999_v31 }
 0x2cc   : > { %1363 = vmatpush.msra.mxu2 %v1025_v8  ;;  %1364 = vmatpush.msra.mxu3 %v1025_v8  ;;  %v1440_v30 = vpop.eup %1439  ;;  %1451 = vtanh.f32 %v987_v33 }
 0x2cd   : > { %1044 = vmatpush.msra.mxu0 %v1025_v8  ;;  %1362 = vmatpush.msra.mxu1 %v1025_v8  ;;  %v1442_v32 = vpop.eup %1441  ;;  %1453 = vtanh.f32 %v991_v35 }
 0x2ce   : > { %1366 = vmatpush.msra.mxu2 %v1024_v9  ;;  %1367 = vmatpush.msra.mxu3 %v1024_v9  ;;  %v1444_v34 = vpop.eup %1443  ;;  %1455 = vtanh.f32 %v996_v37 }
 0x2cf   : > { %1045 = vmatpush.msra.mxu0 %v1024_v9  ;;  %1365 = vmatpush.msra.mxu1 %v1024_v9  ;;  %v1446_v36 = vpop.eup %1445  ;;  %1457 = vtanh.f32 %v1000_v39 }
 0x2d0   : > { %1369 = vmatpush.msra.mxu2 %v1023_v10  ;;  %1370 = vmatpush.msra.mxu3 %v1023_v10  ;;  %v1448_v38 = vpop.eup %1447  ;;  %1459 = vtanh.f32 %v988_v41 }
 0x2d1   : > { %1046 = vmatpush.msra.mxu0 %v1023_v10  ;;  %1368 = vmatpush.msra.mxu1 %v1023_v10  ;;  %v1450_v40 = vpop.eup %1449  ;;  %1461 = vtanh.f32 %v992_v43 }
 0x2d2   : > { %1372 = vmatpush.msra.mxu2 %v1022_v11  ;;  %1373 = vmatpush.msra.mxu3 %v1022_v11  ;;  %v1452_v42 = vpop.eup %1451 }
 0x2d3   : > { %1047 = vmatpush.msra.mxu0 %v1022_v11  ;;  %1371 = vmatpush.msra.mxu1 %v1022_v11  ;;  %v1454_v44 = vpop.eup %1453 }
 0x2d4   : > { %1375 = vmatpush.msra.mxu2 %v1021_v13  ;;  %1376 = vmatpush.msra.mxu3 %v1021_v13  ;;  %v1456_v45 = vpop.eup %1455 }
 0x2d5   : > { %1048 = vmatpush.msra.mxu0 %v1021_v13  ;;  %1374 = vmatpush.msra.mxu1 %v1021_v13  ;;  %v1458_v46 = vpop.eup %1457 }
 0x2d6   : > { %1378 = vmatpush.msra.mxu2 %v1020_v16  ;;  %1379 = vmatpush.msra.mxu3 %v1020_v16  ;;  %v1460_v47 = vpop.eup %1459 }
 0x2d7   : > { %1049 = vmatpush.msra.mxu0 %v1020_v16  ;;  %1377 = vmatpush.msra.mxu1 %v1020_v16  ;;  %v1462_v48 = vpop.eup %1461 }
 0x2d8   : > { %1381 = vmatpush.msra.mxu2 %v1019_v18  ;;  %1382 = vmatpush.msra.mxu3 %v1019_v18 }
 0x2d9   : > { %1050 = vmatpush.msra.mxu0 %v1019_v18  ;;  %1380 = vmatpush.msra.mxu1 %v1019_v18 }
 0x2da   : > { %1384 = vmatpush.msra.mxu2 %v1018_v19  ;;  %1385 = vmatpush.msra.mxu3 %v1018_v19 }
 0x2db   : > { %1051 = vmatpush.msra.mxu0 %v1018_v19  ;;  %1383 = vmatpush.msra.mxu1 %v1018_v19 }
 0x2dc   : > { %1387 = vmatpush.msra.mxu2 %v1017_v22  ;;  %1388 = vmatpush.msra.mxu3 %v1017_v22 }
 0x2dd   : > { %1077 = vmatmul.f32.vlgmr.msra.gmra.mxu2 %v1432_v21  ;;  %1089 = vmatmul.f32.vlgmr.msra.gmra.mxu3 %v1434_v24 }
 0x2de   : > { %1052 = vmatpush.msra.mxu0 %v1017_v22  ;;  %1386 = vmatpush.msra.mxu1 %v1017_v22 }
 0x2df   : > { %1053 = vmatmul.f32.vlgmr.msra.gmra.mxu0 %v1436_v26  ;;  %1065 = vmatmul.f32.vlgmr.msra.gmra.mxu1 %v1438_v28 }
 0x2e5   : > { %1080 = vmatmul.f32.gmra.mxu2 %v1440_v30  ;;  %1092 = vmatmul.f32.gmra.mxu3 %v1442_v32 }
 0x2e7   : > { %1056 = vmatmul.f32.gmra.mxu0 %v1444_v34  ;;  %1068 = vmatmul.f32.gmra.mxu1 %v1446_v36 }
 0x2ed   : > { %1083 = vmatmul.f32.gmra.mxu2 %v1448_v38  ;;  %1095 = vmatmul.f32.gmra.mxu3 %v1450_v40 }
 0x2ef   : > { %1059 = vmatmul.f32.gmra.mxu0 %v1452_v42  ;;  %1071 = vmatmul.f32.gmra.mxu1 %v1454_v44 }
 0x2f5   : > { %1086 = vmatmul.f32.gmra.mxu2 %v1456_v45  ;;  %1098 = vmatmul.f32.gmra.mxu3 %v1458_v46 }
 0x2f7   : > { %1062 = vmatmul.f32.gmra.mxu0 %v1460_v47  ;;  %1074 = vmatmul.f32.gmra.mxu1 %v1462_v48 }
 0x35c   : > { %v1054_v50 = vpop.f32.mrf.mxu0  ;;  %v1066_v51 = vpop.f32.mrf.mxu1 }
 0x35d   : > { %v1055_v52 = vadd.f32 %v1430_v49, %v1054_v50  ;;  %v1067_v53 = vadd.f32 %v1430_v49, %v1066_v51 }
 0x35f   : > { %1102 = vst [vmem:[%s1595_s20] sm:$0xff] %v1055_v52 }
 0x360   : > { %1106 = vst [vmem:[%s1595_s20 + $0x20] sm:$0xff] %v1067_v53  ;;  %v1078_v54 = vpop.f32.mrf.mxu2  ;;  %v1090_v55 = vpop.f32.mrf.mxu3 }
 0x361   : > { %v1079_v56 = vadd.f32 %v1430_v49, %v1078_v54  ;;  %v1091_v57 = vadd.f32 %v1430_v49, %v1090_v55 }
 0x363   : > { %1110 = vst [vmem:[%s1595_s20 + $0x40] sm:$0xff] %v1079_v56 }
 0x364   : > { %1114 = vst [vmem:[%s1595_s20 + $0x60] sm:$0xff] %v1091_v57  ;;  %v1057_v58 = vpop.f32.mrf.mxu0  ;;  %v1069_v59 = vpop.f32.mrf.mxu1 }
 0x365   : > { %v1058_v60 = vadd.f32 %v1430_v49, %v1057_v58  ;;  %v1070_v61 = vadd.f32 %v1430_v49, %v1069_v59 }
 0x367   : > { %1103 = vst [vmem:[%s1595_s20 + $0x8] sm:$0xff] %v1058_v60 }
 0x368   : > { %1107 = vst [vmem:[%s1595_s20 + $0x28] sm:$0xff] %v1070_v61  ;;  %v1081_v62 = vpop.f32.mrf.mxu2  ;;  %v1093_v63 = vpop.f32.mrf.mxu3 }
 0x369   : > { %v1082_v0 = vadd.f32 %v1430_v49, %v1081_v62  ;;  %v1094_v1 = vadd.f32 %v1430_v49, %v1093_v63 }
 0x36b   : > { %1111 = vst [vmem:[%s1595_s20 + $0x48] sm:$0xff] %v1082_v0 }
 0x36c   : > { %1115 = vst [vmem:[%s1595_s20 + $0x68] sm:$0xff] %v1094_v1  ;;  %v1060_v2 = vpop.f32.mrf.mxu0  ;;  %v1072_v3 = vpop.f32.mrf.mxu1 }
 0x36d   : > { %v1061_v4 = vadd.f32 %v1430_v49, %v1060_v2  ;;  %v1073_v5 = vadd.f32 %v1430_v49, %v1072_v3 }
 0x36f   : > { %1104 = vst [vmem:[%s1595_s20 + $0x10] sm:$0xff] %v1061_v4 }
 0x370   : > { %1108 = vst [vmem:[%s1595_s20 + $0x30] sm:$0xff] %v1073_v5  ;;  %v1084_v6 = vpop.f32.mrf.mxu2  ;;  %v1096_v7 = vpop.f32.mrf.mxu3 }
 0x371   : > { %v1085_v8 = vadd.f32 %v1430_v49, %v1084_v6  ;;  %v1097_v9 = vadd.f32 %v1430_v49, %v1096_v7 }
 0x373   : > { %1112 = vst [vmem:[%s1595_s20 + $0x50] sm:$0xff] %v1085_v8 }
 0x374   : > { %1116 = vst [vmem:[%s1595_s20 + $0x70] sm:$0xff] %v1097_v9  ;;  %v1063_v10 = vpop.f32.mrf.mxu0  ;;  %v1075_v11 = vpop.f32.mrf.mxu1 }
 0x375   : > { %v1064_v12 = vadd.f32 %v1430_v49, %v1063_v10  ;;  %v1076_v13 = vadd.f32 %v1430_v49, %v1075_v11 }
 0x377   : > { %1105 = vst [vmem:[%s1595_s20 + $0x18] sm:$0xff] %v1064_v12 }
 0x378   : > { %1109 = vst [vmem:[%s1595_s20 + $0x38] sm:$0xff] %v1076_v13  ;;  %v1087_v14 = vpop.f32.mrf.mxu2  ;;  %v1099_v15 = vpop.f32.mrf.mxu3 }
 0x379   : > { %v1088_v16 = vadd.f32 %v1430_v49, %v1087_v14  ;;  %v1100_v17 = vadd.f32 %v1430_v49, %v1099_v15 }
 0x37b   : > { %1113 = vst [vmem:[%s1595_s20 + $0x58] sm:$0xff] %v1088_v16 }
 0x37c   : > { %1117 = vst [vmem:[%s1595_s20 + $0x78] sm:$0xff] %v1100_v17 }
 0x37d PF: > { %s16_s25 = sadd.s32 1, %s1501_s25   ;;  %s1944_s21 = smov %s1493_s23 }
 0x37e   : > { %p13_p3 = scmp.ge.s32.totalorder %s16_s25, 8   ;;  %s1945_s22 = smov %s1497_s24 }
 0x37f   : > { %s1946_s23 = smov %s1949_s26  ;;  %s1947_s24 = smov %s1953_s27 }
 0x380   :  { %15 = sbr.rel (!%p13_p3) target bundleno = 3 (0x3), region = 99 }

</bundles_post_ra>
